<compile_context>
chip_gen: v6e
topology: v6e:2x2x1
jax: 0.10.0
libtpu: 0.0.40
codegen_flags: <defaults>
</compile_context>

<pallas_src>
import functools

import jax
import jax.numpy as jnp
from jax.experimental import pallas as pl
from jax.experimental.pallas import tpu as pltpu


def _round_up(v, m):
    return ((v + m - 1) // m) * m


def _sigmoid_via_tanh(x):
    # sigmoid(x) == 0.5*tanh(0.5*x) + 0.5  -> single EUP push per gate instead
    # of a possible exp + reciprocal pair on the serial recurrence chain.
    return 0.5 * jnp.tanh(0.5 * x) + 0.5


# ---------------------------------------------------------------------------
# kernel
# ---------------------------------------------------------------------------
def _siamese_gru_fc_kernel(x_ref, wi_ref, wh_ref, b_all_ref, b_hn_ref,
                           wfc_ref, bfc_ref, out_ref, gi_ref, hh_ref,
                           *, seq_len, bp, gw, fp):
    """Whole siamese forward (both branches folded into the batch axis).

    Refs:
      x_ref     : (S*BP, I)     time-major input slab (both branches in batch)
      wi_ref    : (I, 3*GW)     fused, per-gate 128-lane padded W_i[r|z|n]
      wh_ref    : (GW, 3*GW)    fused, padded W_h[r|z|n] (rows H..GW are zero)
      b_all_ref : (1, 3*GW)     [b_ir+b_hr | b_iz+b_hz | b_in]
      b_hn_ref  : (1, GW)       b_hn (stays inside the r*(...) term)
      wfc_ref   : (GW, FP)      fc1.weight^T, zero-padded
      bfc_ref   : (1, FP)       fc1.bias, zero-padded
      out_ref   : (BP, S*FP)    batch-major output, ReLU(FC(h))
      gi_ref    : (S*BP, 3*GW)  VMEM scratch: hoisted input projections
      hh_ref    : (S*BP, GW)    VMEM scratch: full hidden history
    """
    # Hoisted, fused input projection over the whole sequence: one MXU matmul
    # + one bias add, stored to VMEM scratch (keeps per-step live ranges small).
    gi_ref[...] = (jnp.dot(x_ref[...], wi_ref[...],
                           preferred_element_type=jnp.float32) + b_all_ref[...])

    wh = wh_ref[...]            # resident fused hidden->hidden weights
    b_hn = b_hn_ref[...]

    def step(lo, h):
        gi = gi_ref[pl.ds(lo, bp), :]                              # (bp, 3*gw)
        # Single fused MXU push per step on the serial recurrence chain.
        gh = jnp.dot(h, wh, preferred_element_type=jnp.float32)    # (bp, 3*gw)
        r = _sigmoid_via_tanh(gi[:, :gw] + gh[:, :gw])
        z = _sigmoid_via_tanh(gi[:, gw:2 * gw] + gh[:, gw:2 * gw])
        n = jnp.tanh(gi[:, 2 * gw:] + r * (gh[:, 2 * gw:] + b_hn))
        h_new = (1.0 - z) * n + z * h
        hh_ref[pl.ds(lo, bp), :] = h_new          # lane-dense (bp, 128k) store
        return h_new

    h = jnp.zeros((bp, gw), jnp.float32)          # init_hx = zeros; padded
    if seq_len <= 16:                             # lanes provably stay zero.
        for s in range(seq_len):                  # short seq: static unroll
            h = step(s * bp, h)
    else:                                         # long seq: bound live ranges
        jax.lax.fori_loop(
            0, seq_len,
            lambda s, hc: step(pl.multiple_of(s * bp, bp), hc),
            h)

    # Fused FC + ReLU over the whole hidden history: one MXU matmul.
    y = jnp.maximum(
        jnp.dot(hh_ref[...], wfc_ref[...], preferred_element_type=jnp.float32)
        + bfc_ref[...], 0.0)                      # (seq_len*bp, fp)

    # Write batch-major output: out[b, s*fp + f] = y[s*bp + b, f].
    # Each store is an aligned, unmasked (bp, fp) lane-dense tile, and the host
    # wrapper needs no post-transpose.
    for s in range(seq_len):
        out_ref[:, s * fp:(s + 1) * fp] = y[s * bp:(s + 1) * bp, :]


# ---------------------------------------------------------------------------
# host-side weight prep (fuse + 128-lane pad the gates, fold r/z biases)
# ---------------------------------------------------------------------------
def _prep_padded_params(params, gw, fp):
    wih, whh, bih, bhh, wfc, bfc = params
    H = whh.shape[0]
    F = wfc.shape[1]

    def gates(w):  # split fused (., 3H) into gates, pad each gate to gw lanes
        return [jnp.pad(w[:, g * H:(g + 1) * H], ((0, 0), (0, gw - H)))
                for g in range(3)]

    w_ir, w_iz, w_in = gates(wih)
    w_hr, w_hz, w_hn = gates(whh)
    b_ir, b_iz, b_in = gates(bih)
    b_hr, b_hz, b_hn = gates(bhh)

    wi_all = jnp.concatenate([w_ir, w_iz, w_in], axis=1)            # (I, 3*gw)
    wh_all = jnp.concatenate([w_hr, w_hz, w_hn], axis=1)            # (H, 3*gw)
    wh_all = jnp.pad(wh_all, ((0, gw - H), (0, 0)))                 # (gw, 3*gw)
    # r/z biases folded (b_ih + b_hh); n keeps b_in here, b_hn stays in r*(...)
    b_all = jnp.concatenate([b_ir + b_hr, b_iz + b_hz, b_in], axis=1)
    wfc_p = jnp.pad(wfc, ((0, gw - H), (0, fp - F)))                # (gw, fp)
    bfc_p = jnp.pad(bfc, ((0, 0), (0, fp - F)))                     # (1, fp)
    return wi_all, wh_all, b_all, b_hn, wfc_p, bfc_p


# ---------------------------------------------------------------------------
# wrapper
# ---------------------------------------------------------------------------
@jax.jit
def siamese_branch_pallas(x1, x2, params):
    """x1, x2: (batch, n_nodes, input_dim) -> two (batch, n_nodes, fc_dim)."""
    B, S, I = x1.shape
    _, whh, _, _, wfc, _ = params
    H = whh.shape[0]
    F = wfc.shape[1]

    GW = _round_up(H, 128)        # per-gate lane width == padded hidden width
    FP = _round_up(F, 128)        # padded FC output lanes
    B2 = 2 * B                    # both branches folded into the batch axis
    BP = _round_up(B2, 8)         # pad combined batch to a sublane multiple

    # Input relayout: (B,S,I) x2 -> time-major padded slab (S*BP, I).
    x = jnp.concatenate([x1, x2], axis=0)          # (2B, S, I)
    x = jnp.transpose(x, (1, 0, 2))                # (S, 2B, I)
    if BP != B2:
        x = jnp.pad(x, ((0, 0), (0, BP - B2), (0, 0)))
    x = x.reshape(S * BP, I)                       # free reshape

    wi_all, wh_all, b_all, b_hn, wfc_p, bfc_p = _prep_padded_params(params, GW, FP)

    # VMEM budget guard for the whole-sequence-in-VMEM design (32 MiB scoped
    # default on v6e/v7x; v7x only has 64 MiB physical).
    vmem_bytes = 4 * (
        2 * (S * BP * I + BP * S * FP)                      # dbl-buffered in/out
        + S * BP * (3 * GW + GW)                            # gi + hidden history
        + 2 * (I * 3 * GW + GW * 3 * GW + GW * FP + 4 * GW + FP))  # weights
    if vmem_bytes > 24 * 1024 * 1024:
        # TODO(synk): for large S*B, move the time axis into an "arbitrary" grid
        # dimension (h carried in scratch) so the design fits v7x's 64 MiB VMEM.
        raise NotImplementedError(
            f"whole-sequence-in-VMEM layout needs ~{vmem_bytes >> 20} MiB VMEM; "
            "add time-chunking for this shape")

    kernel = functools.partial(_siamese_gru_fc_kernel,
                               seq_len=S, bp=BP, gw=GW, fp=FP)
    full2d = lambda i: (0, 0)

    out = pl.pallas_call(
        kernel,
        out_shape=jax.ShapeDtypeStruct((BP, S * FP), jnp.float32),
        grid_spec=pltpu.PrefetchScalarGridSpec(
            num_scalar_prefetch=0,
            grid=(1,),                            # single fused invocation
            in_specs=[
                pl.BlockSpec((S * BP, I), full2d),        # x
                pl.BlockSpec((I, 3 * GW), full2d),        # W_i (fused, padded)
                pl.BlockSpec((GW, 3 * GW), full2d),       # W_h (fused, padded)
                pl.BlockSpec((1, 3 * GW), full2d),        # folded biases
                pl.BlockSpec((1, GW), full2d),            # b_hn
                pl.BlockSpec((GW, FP), full2d),           # fc weight
                pl.BlockSpec((1, FP), full2d),            # fc bias
            ],
            out_specs=pl.BlockSpec((BP, S * FP), full2d),
            scratch_shapes=[
                pltpu.VMEM((S * BP, 3 * GW), jnp.float32),  # hoisted gate proj
                pltpu.VMEM((S * BP, GW), jnp.float32),      # hidden history
            ],
        ),
        compiler_params=pltpu.CompilerParams(
            dimension_semantics=("arbitrary",),
        ),
    )(x, wi_all, wh_all, b_all, b_hn, wfc_p, bfc_p)

    # (BP, S*FP) -> (2B, S, F): free reshape + row/lane slice, no transpose.
    out = out.reshape(BP, S, FP)[:B2, :, :F]
    return out[:B], out[B:]


def siamese_branch(g1, g2, params):
    """Siamese_Banch.forward: same PrtLayer applied to both inputs."""
    return siamese_branch_pallas(g1[0], g2[0], params)


# ---------------------------------------------------------------------------
# pure-JAX reference (silent correctness check)
# ---------------------------------------------------------------------------
def _prt_layer_ref(x_bsi, params):
    wih, whh, bih, bhh, wfc, bfc = params
    B, S, I = x_bsi.shape
    H = whh.shape[0]
    x_sbi = jnp.transpose(x_bsi, (1, 0, 2))

    def step(h, x):
        gi = x @ wih + bih
        gh = h @ whh + bhh
        r = jax.nn.sigmoid(gi[:, :H] + gh[:, :H])
        z = jax.nn.sigmoid(gi[:, H:2 * H] + gh[:, H:2 * H])
        n = jnp.tanh(gi[:, 2 * H:] + r * gh[:, 2 * H:])
        h_new = (1.0 - z) * n + z * h
        return h_new, h_new

    h0 = jnp.zeros((B, H), jnp.float32)
    _, hs = jax.lax.scan(step, h0, x_sbi)          # (S, B, H)
    y = jnp.maximum(hs @ wfc + bfc, 0.0)           # (S, B, F)
    return jnp.transpose(y, (1, 0, 2))


def init_params(key, input_dim, hidden_dim, fc_dim):
    ks = jax.random.split(key, 6)
    scale = 1.0 / jnp.sqrt(hidden_dim)
    wih = jax.random.uniform(ks[0], (input_dim, 3 * hidden_dim), jnp.float32, -scale, scale)
    whh = jax.random.uniform(ks[1], (hidden_dim, 3 * hidden_dim), jnp.float32, -scale, scale)
    bih = jax.random.uniform(ks[2], (1, 3 * hidden_dim), jnp.float32, -scale, scale)
    bhh = jax.random.uniform(ks[3], (1, 3 * hidden_dim), jnp.float32, -scale, scale)
    wfc = jax.random.uniform(ks[4], (hidden_dim, fc_dim), jnp.float32, -scale, scale)
    bfc = jax.random.uniform(ks[5], (1, fc_dim), jnp.float32, -scale, scale)
    return (wih, whh, bih, bhh, wfc, bfc)


if __name__ == "__main__":
    # small shapes: batch=2, n_nodes(seq)=8, input_dim=8, hidden=16, fc_dim=32
    B, S, I, H, F = 2, 8, 8, 16, 32
    key = jax.random.PRNGKey(0)
    k1, k2, kp = jax.random.split(key, 3)

    x1 = jax.random.normal(k1, (B, S, I), jnp.float32)
    x2 = jax.random.normal(k2, (B, S, I), jnp.float32)
    params = init_params(kp, I, H, F)

    g1 = (x1, None, None)
    g2 = (x2, None, None)

    out1, out2 = siamese_branch(g1, g2, params)
    out1 = jax.block_until_ready(out1)
    out2 = jax.block_until_ready(out2)

    # silent correctness check against pure-JAX reference
    ref1 = _prt_layer_ref(x1, params)
    ref2 = _prt_layer_ref(x2, params)
    assert out1.shape == (B, S, F) and out2.shape == (B, S, F)
    assert jnp.allclose(out1, ref1, atol=1e-4, rtol=1e-4)
    assert jnp.allclose(out2, ref2, atol=1e-4, rtol=1e-4)

    print("KERNEL_OK")
</pallas_src>

<mosaic_0001>
module attributes {stable_mosaic.version = 11 : i64} {
  func.func @_siamese_gru_fc_kernel(%arg0: i32, %arg1: memref<64x8xf32, #tpu.memory_space<vmem>>, %arg2: memref<8x384xf32, #tpu.memory_space<vmem>>, %arg3: memref<128x384xf32, #tpu.memory_space<vmem>>, %arg4: memref<1x384xf32, #tpu.memory_space<vmem>>, %arg5: memref<1x128xf32, #tpu.memory_space<vmem>>, %arg6: memref<128x128xf32, #tpu.memory_space<vmem>>, %arg7: memref<1x128xf32, #tpu.memory_space<vmem>>, %arg8: memref<8x1024xf32, #tpu.memory_space<vmem>>, %arg9: memref<64x384xf32, #tpu.memory_space<vmem>>, %arg10: memref<64x128xf32, #tpu.memory_space<vmem>>) attributes {dimension_semantics = [#tpu.dimension_semantics<arbitrary>], iteration_bounds = array<i64: 1>, scalar_prefetch = 0 : i64, scratch_operands = 2 : i64, tpu.core_type = #tpu.core_type<tc>, window_params = [{pipeline_mode = #tpu.pipeline_mode<synchronous>, transform_indices = @transform_0, window_bounds = array<i64: 64, 8>}, {pipeline_mode = #tpu.pipeline_mode<synchronous>, transform_indices = @transform_1, window_bounds = array<i64: 8, 384>}, {pipeline_mode = #tpu.pipeline_mode<synchronous>, transform_indices = @transform_2, window_bounds = array<i64: 128, 384>}, {pipeline_mode = #tpu.pipeline_mode<synchronous>, transform_indices = @transform_3, window_bounds = array<i64: 1, 384>}, {pipeline_mode = #tpu.pipeline_mode<synchronous>, transform_indices = @transform_4, window_bounds = array<i64: 1, 128>}, {pipeline_mode = #tpu.pipeline_mode<synchronous>, transform_indices = @transform_5, window_bounds = array<i64: 128, 128>}, {pipeline_mode = #tpu.pipeline_mode<synchronous>, transform_indices = @transform_6, window_bounds = array<i64: 1, 128>}, {pipeline_mode = #tpu.pipeline_mode<synchronous>, transform_indices = @transform_7, window_bounds = array<i64: 8, 1024>}]} {
    %c0 = arith.constant 0 : index
    %c0_0 = arith.constant 0 : index
    %0 = vector.load %arg1[%c0, %c0_0] : memref<64x8xf32, #tpu.memory_space<vmem>>, vector<64x8xf32>
    %c0_1 = arith.constant 0 : index
    %c0_2 = arith.constant 0 : index
    %1 = vector.load %arg2[%c0_1, %c0_2] : memref<8x384xf32, #tpu.memory_space<vmem>>, vector<8x384xf32>
    %cst = arith.constant dense<0.000000e+00> : vector<64x384xf32>
    %2 = tpu.matmul %0, %1, %cst {dimension_numbers = #tpu.dot_dimension_numbers<[1], [0], [0], [1], [0, 0, 1, 1], [], []>} : vector<64x8xf32>, vector<8x384xf32>, vector<64x384xf32> -> vector<64x384xf32>
    %c0_3 = arith.constant 0 : index
    %c0_4 = arith.constant 0 : index
    %3 = vector.load %arg4[%c0_3, %c0_4] : memref<1x384xf32, #tpu.memory_space<vmem>>, vector<1x384xf32>
    %4 = vector.broadcast %3 : vector<1x384xf32> to vector<64x384xf32>
    %5 = arith.addf %2, %4 : vector<64x384xf32>
    %c0_5 = arith.constant 0 : index
    %c0_6 = arith.constant 0 : index
    %6 = vector.load %arg9[%c0_5, %c0_6] : memref<64x384xf32, #tpu.memory_space<vmem>>, vector<64x384xf32>
    tpu.vector_store %arg9[%c0_5, %c0_6], %5 {strides = array<i32>} : memref<64x384xf32, #tpu.memory_space<vmem>>, vector<64x384xf32>,
    %c0_7 = arith.constant 0 : index
    %c0_8 = arith.constant 0 : index
    %7 = vector.load %arg3[%c0_7, %c0_8] : memref<128x384xf32, #tpu.memory_space<vmem>>, vector<128x384xf32>
    %c0_9 = arith.constant 0 : index
    %c0_10 = arith.constant 0 : index
    %8 = vector.load %arg5[%c0_9, %c0_10] : memref<1x128xf32, #tpu.memory_space<vmem>>, vector<1x128xf32>
    %cst_11 = arith.constant 0.000000e+00 : f32
    %9 = vector.broadcast %cst_11 : f32 to vector<8x128xf32>
    %c0_12 = arith.constant 0 : index
    %c0_13 = arith.constant 0 : index
    %10 = vector.load %arg9[%c0_12, %c0_13] : memref<64x384xf32, #tpu.memory_space<vmem>>, vector<8x384xf32>
    %cst_14 = arith.constant dense<0.000000e+00> : vector<8x384xf32>
    %11 = tpu.matmul %9, %7, %cst_14 {dimension_numbers = #tpu.dot_dimension_numbers<[1], [0], [0], [1], [0, 0, 1, 1], [], []>} : vector<8x128xf32>, vector<128x384xf32>, vector<8x384xf32> -> vector<8x384xf32>
    %12 = vector.extract_strided_slice %10 {offsets = [0, 0], sizes = [8, 128], strides = [1, 1]} : vector<8x384xf32> to vector<8x128xf32>
    %13 = vector.extract_strided_slice %11 {offsets = [0, 0], sizes = [8, 128], strides = [1, 1]} : vector<8x384xf32> to vector<8x128xf32>
    %14 = arith.addf %12, %13 : vector<8x128xf32>
    %cst_15 = arith.constant 5.000000e-01 : f32
    %15 = vector.broadcast %cst_15 : f32 to vector<8x128xf32>
    %16 = arith.mulf %15, %14 : vector<8x128xf32>
    %17 = math.tanh %16 : vector<8x128xf32>
    %cst_16 = arith.constant 5.000000e-01 : f32
    %18 = vector.broadcast %cst_16 : f32 to vector<8x128xf32>
    %19 = arith.mulf %18, %17 : vector<8x128xf32>
    %cst_17 = arith.constant 5.000000e-01 : f32
    %20 = vector.broadcast %cst_17 : f32 to vector<8x128xf32>
    %21 = arith.addf %19, %20 : vector<8x128xf32>
    %22 = vector.extract_strided_slice %10 {offsets = [0, 128], sizes = [8, 128], strides = [1, 1]} : vector<8x384xf32> to vector<8x128xf32>
    %23 = vector.extract_strided_slice %11 {offsets = [0, 128], sizes = [8, 128], strides = [1, 1]} : vector<8x384xf32> to vector<8x128xf32>
    %24 = arith.addf %22, %23 : vector<8x128xf32>
    %cst_18 = arith.constant 5.000000e-01 : f32
    %25 = vector.broadcast %cst_18 : f32 to vector<8x128xf32>
    %26 = arith.mulf %25, %24 : vector<8x128xf32>
    %27 = math.tanh %26 : vector<8x128xf32>
    %cst_19 = arith.constant 5.000000e-01 : f32
    %28 = vector.broadcast %cst_19 : f32 to vector<8x128xf32>
    %29 = arith.mulf %28, %27 : vector<8x128xf32>
    %cst_20 = arith.constant 5.000000e-01 : f32
    %30 = vector.broadcast %cst_20 : f32 to vector<8x128xf32>
    %31 = arith.addf %29, %30 : vector<8x128xf32>
    %32 = vector.extract_strided_slice %10 {offsets = [0, 256], sizes = [8, 128], strides = [1, 1]} : vector<8x384xf32> to vector<8x128xf32>
    %33 = vector.extract_strided_slice %11 {offsets = [0, 256], sizes = [8, 128], strides = [1, 1]} : vector<8x384xf32> to vector<8x128xf32>
    %34 = vector.broadcast %8 : vector<1x128xf32> to vector<8x128xf32>
    %35 = arith.addf %33, %34 : vector<8x128xf32>
    %36 = arith.mulf %21, %35 : vector<8x128xf32>
    %37 = arith.addf %32, %36 : vector<8x128xf32>
    %38 = math.tanh %37 : vector<8x128xf32>
    %cst_21 = arith.constant 1.000000e+00 : f32
    %39 = vector.broadcast %cst_21 : f32 to vector<8x128xf32>
    %40 = arith.subf %39, %31 : vector<8x128xf32>
    %41 = arith.mulf %40, %38 : vector<8x128xf32>
    %42 = arith.mulf %31, %9 : vector<8x128xf32>
    %43 = arith.addf %41, %42 : vector<8x128xf32>
    %c0_22 = arith.constant 0 : index
    %c0_23 = arith.constant 0 : index
    %44 = vector.load %arg10[%c0_22, %c0_23] : memref<64x128xf32, #tpu.memory_space<vmem>>, vector<8x128xf32>
    tpu.vector_store %arg10[%c0_22, %c0_23], %43 {strides = array<i32>} : memref<64x128xf32, #tpu.memory_space<vmem>>, vector<8x128xf32>,
    %c8 = arith.constant 8 : index
    %c0_24 = arith.constant 0 : index
    %45 = vector.load %arg9[%c8, %c0_24] : memref<64x384xf32, #tpu.memory_space<vmem>>, vector<8x384xf32>
    %cst_25 = arith.constant dense<0.000000e+00> : vector<8x384xf32>
    %46 = tpu.matmul %43, %7, %cst_25 {dimension_numbers = #tpu.dot_dimension_numbers<[1], [0], [0], [1], [0, 0, 1, 1], [], []>} : vector<8x128xf32>, vector<128x384xf32>, vector<8x384xf32> -> vector<8x384xf32>
    %47 = vector.extract_strided_slice %45 {offsets = [0, 0], sizes = [8, 128], strides = [1, 1]} : vector<8x384xf32> to vector<8x128xf32>
    %48 = vector.extract_strided_slice %46 {offsets = [0, 0], sizes = [8, 128], strides = [1, 1]} : vector<8x384xf32> to vector<8x128xf32>
    %49 = arith.addf %47, %48 : vector<8x128xf32>
    %cst_26 = arith.constant 5.000000e-01 : f32
    %50 = vector.broadcast %cst_26 : f32 to vector<8x128xf32>
    %51 = arith.mulf %50, %49 : vector<8x128xf32>
    %52 = math.tanh %51 : vector<8x128xf32>
    %cst_27 = arith.constant 5.000000e-01 : f32
    %53 = vector.broadcast %cst_27 : f32 to vector<8x128xf32>
    %54 = arith.mulf %53, %52 : vector<8x128xf32>
    %cst_28 = arith.constant 5.000000e-01 : f32
    %55 = vector.broadcast %cst_28 : f32 to vector<8x128xf32>
    %56 = arith.addf %54, %55 : vector<8x128xf32>
    %57 = vector.extract_strided_slice %45 {offsets = [0, 128], sizes = [8, 128], strides = [1, 1]} : vector<8x384xf32> to vector<8x128xf32>
    %58 = vector.extract_strided_slice %46 {offsets = [0, 128], sizes = [8, 128], strides = [1, 1]} : vector<8x384xf32> to vector<8x128xf32>
    %59 = arith.addf %57, %58 : vector<8x128xf32>
    %cst_29 = arith.constant 5.000000e-01 : f32
    %60 = vector.broadcast %cst_29 : f32 to vector<8x128xf32>
    %61 = arith.mulf %60, %59 : vector<8x128xf32>
    %62 = math.tanh %61 : vector<8x128xf32>
    %cst_30 = arith.constant 5.000000e-01 : f32
    %63 = vector.broadcast %cst_30 : f32 to vector<8x128xf32>
    %64 = arith.mulf %63, %62 : vector<8x128xf32>
    %cst_31 = arith.constant 5.000000e-01 : f32
    %65 = vector.broadcast %cst_31 : f32 to vector<8x128xf32>
    %66 = arith.addf %64, %65 : vector<8x128xf32>
    %67 = vector.extract_strided_slice %45 {offsets = [0, 256], sizes = [8, 128], strides = [1, 1]} : vector<8x384xf32> to vector<8x128xf32>
    %68 = vector.extract_strided_slice %46 {offsets = [0, 256], sizes = [8, 128], strides = [1, 1]} : vector<8x384xf32> to vector<8x128xf32>
    %69 = vector.broadcast %8 : vector<1x128xf32> to vector<8x128xf32>
    %70 = arith.addf %68, %69 : vector<8x128xf32>
    %71 = arith.mulf %56, %70 : vector<8x128xf32>
    %72 = arith.addf %67, %71 : vector<8x128xf32>
    %73 = math.tanh %72 : vector<8x128xf32>
    %cst_32 = arith.constant 1.000000e+00 : f32
    %74 = vector.broadcast %cst_32 : f32 to vector<8x128xf32>
    %75 = arith.subf %74, %66 : vector<8x128xf32>
    %76 = arith.mulf %75, %73 : vector<8x128xf32>
    %77 = arith.mulf %66, %43 : vector<8x128xf32>
    %78 = arith.addf %76, %77 : vector<8x128xf32>
    %c8_33 = arith.constant 8 : index
    %c0_34 = arith.constant 0 : index
    %79 = vector.load %arg10[%c8_33, %c0_34] : memref<64x128xf32, #tpu.memory_space<vmem>>, vector<8x128xf32>
    tpu.vector_store %arg10[%c8_33, %c0_34], %78 {strides = array<i32>} : memref<64x128xf32, #tpu.memory_space<vmem>>, vector<8x128xf32>,
    %c16 = arith.constant 16 : index
    %c0_35 = arith.constant 0 : index
    %80 = vector.load %arg9[%c16, %c0_35] : memref<64x384xf32, #tpu.memory_space<vmem>>, vector<8x384xf32>
    %cst_36 = arith.constant dense<0.000000e+00> : vector<8x384xf32>
    %81 = tpu.matmul %78, %7, %cst_36 {dimension_numbers = #tpu.dot_dimension_numbers<[1], [0], [0], [1], [0, 0, 1, 1], [], []>} : vector<8x128xf32>, vector<128x384xf32>, vector<8x384xf32> -> vector<8x384xf32>
    %82 = vector.extract_strided_slice %80 {offsets = [0, 0], sizes = [8, 128], strides = [1, 1]} : vector<8x384xf32> to vector<8x128xf32>
    %83 = vector.extract_strided_slice %81 {offsets = [0, 0], sizes = [8, 128], strides = [1, 1]} : vector<8x384xf32> to vector<8x128xf32>
    %84 = arith.addf %82, %83 : vector<8x128xf32>
    %cst_37 = arith.constant 5.000000e-01 : f32
    %85 = vector.broadcast %cst_37 : f32 to vector<8x128xf32>
    %86 = arith.mulf %85, %84 : vector<8x128xf32>
    %87 = math.tanh %86 : vector<8x128xf32>
    %cst_38 = arith.constant 5.000000e-01 : f32
    %88 = vector.broadcast %cst_38 : f32 to vector<8x128xf32>
    %89 = arith.mulf %88, %87 : vector<8x128xf32>
    %cst_39 = arith.constant 5.000000e-01 : f32
    %90 = vector.broadcast %cst_39 : f32 to vector<8x128xf32>
    %91 = arith.addf %89, %90 : vector<8x128xf32>
    %92 = vector.extract_strided_slice %80 {offsets = [0, 128], sizes = [8, 128], strides = [1, 1]} : vector<8x384xf32> to vector<8x128xf32>
    %93 = vector.extract_strided_slice %81 {offsets = [0, 128], sizes = [8, 128], strides = [1, 1]} : vector<8x384xf32> to vector<8x128xf32>
    %94 = arith.addf %92, %93 : vector<8x128xf32>
    %cst_40 = arith.constant 5.000000e-01 : f32
    %95 = vector.broadcast %cst_40 : f32 to vector<8x128xf32>
    %96 = arith.mulf %95, %94 : vector<8x128xf32>
    %97 = math.tanh %96 : vector<8x128xf32>
    %cst_41 = arith.constant 5.000000e-01 : f32
    %98 = vector.broadcast %cst_41 : f32 to vector<8x128xf32>
    %99 = arith.mulf %98, %97 : vector<8x128xf32>
    %cst_42 = arith.constant 5.000000e-01 : f32
    %100 = vector.broadcast %cst_42 : f32 to vector<8x128xf32>
    %101 = arith.addf %99, %100 : vector<8x128xf32>
    %102 = vector.extract_strided_slice %80 {offsets = [0, 256], sizes = [8, 128], strides = [1, 1]} : vector<8x384xf32> to vector<8x128xf32>
    %103 = vector.extract_strided_slice %81 {offsets = [0, 256], sizes = [8, 128], strides = [1, 1]} : vector<8x384xf32> to vector<8x128xf32>
    %104 = vector.broadcast %8 : vector<1x128xf32> to vector<8x128xf32>
    %105 = arith.addf %103, %104 : vector<8x128xf32>
    %106 = arith.mulf %91, %105 : vector<8x128xf32>
    %107 = arith.addf %102, %106 : vector<8x128xf32>
    %108 = math.tanh %107 : vector<8x128xf32>
    %cst_43 = arith.constant 1.000000e+00 : f32
    %109 = vector.broadcast %cst_43 : f32 to vector<8x128xf32>
    %110 = arith.subf %109, %101 : vector<8x128xf32>
    %111 = arith.mulf %110, %108 : vector<8x128xf32>
    %112 = arith.mulf %101, %78 : vector<8x128xf32>
    %113 = arith.addf %111, %112 : vector<8x128xf32>
    %c16_44 = arith.constant 16 : index
    %c0_45 = arith.constant 0 : index
    %114 = vector.load %arg10[%c16_44, %c0_45] : memref<64x128xf32, #tpu.memory_space<vmem>>, vector<8x128xf32>
    tpu.vector_store %arg10[%c16_44, %c0_45], %113 {strides = array<i32>} : memref<64x128xf32, #tpu.memory_space<vmem>>, vector<8x128xf32>,
    %c24 = arith.constant 24 : index
    %c0_46 = arith.constant 0 : index
    %115 = vector.load %arg9[%c24, %c0_46] : memref<64x384xf32, #tpu.memory_space<vmem>>, vector<8x384xf32>
    %cst_47 = arith.constant dense<0.000000e+00> : vector<8x384xf32>
    %116 = tpu.matmul %113, %7, %cst_47 {dimension_numbers = #tpu.dot_dimension_numbers<[1], [0], [0], [1], [0, 0, 1, 1], [], []>} : vector<8x128xf32>, vector<128x384xf32>, vector<8x384xf32> -> vector<8x384xf32>
    %117 = vector.extract_strided_slice %115 {offsets = [0, 0], sizes = [8, 128], strides = [1, 1]} : vector<8x384xf32> to vector<8x128xf32>
    %118 = vector.extract_strided_slice %116 {offsets = [0, 0], sizes = [8, 128], strides = [1, 1]} : vector<8x384xf32> to vector<8x128xf32>
    %119 = arith.addf %117, %118 : vector<8x128xf32>
    %cst_48 = arith.constant 5.000000e-01 : f32
    %120 = vector.broadcast %cst_48 : f32 to vector<8x128xf32>
    %121 = arith.mulf %120, %119 : vector<8x128xf32>
    %122 = math.tanh %121 : vector<8x128xf32>
    %cst_49 = arith.constant 5.000000e-01 : f32
    %123 = vector.broadcast %cst_49 : f32 to vector<8x128xf32>
    %124 = arith.mulf %123, %122 : vector<8x128xf32>
    %cst_50 = arith.constant 5.000000e-01 : f32
    %125 = vector.broadcast %cst_50 : f32 to vector<8x128xf32>
    %126 = arith.addf %124, %125 : vector<8x128xf32>
    %127 = vector.extract_strided_slice %115 {offsets = [0, 128], sizes = [8, 128], strides = [1, 1]} : vector<8x384xf32> to vector<8x128xf32>
    %128 = vector.extract_strided_slice %116 {offsets = [0, 128], sizes = [8, 128], strides = [1, 1]} : vector<8x384xf32> to vector<8x128xf32>
    %129 = arith.addf %127, %128 : vector<8x128xf32>
    %cst_51 = arith.constant 5.000000e-01 : f32
    %130 = vector.broadcast %cst_51 : f32 to vector<8x128xf32>
    %131 = arith.mulf %130, %129 : vector<8x128xf32>
    %132 = math.tanh %131 : vector<8x128xf32>
    %cst_52 = arith.constant 5.000000e-01 : f32
    %133 = vector.broadcast %cst_52 : f32 to vector<8x128xf32>
    %134 = arith.mulf %133, %132 : vector<8x128xf32>
    %cst_53 = arith.constant 5.000000e-01 : f32
    %135 = vector.broadcast %cst_53 : f32 to vector<8x128xf32>
    %136 = arith.addf %134, %135 : vector<8x128xf32>
    %137 = vector.extract_strided_slice %115 {offsets = [0, 256], sizes = [8, 128], strides = [1, 1]} : vector<8x384xf32> to vector<8x128xf32>
    %138 = vector.extract_strided_slice %116 {offsets = [0, 256], sizes = [8, 128], strides = [1, 1]} : vector<8x384xf32> to vector<8x128xf32>
    %139 = vector.broadcast %8 : vector<1x128xf32> to vector<8x128xf32>
    %140 = arith.addf %138, %139 : vector<8x128xf32>
    %141 = arith.mulf %126, %140 : vector<8x128xf32>
    %142 = arith.addf %137, %141 : vector<8x128xf32>
    %143 = math.tanh %142 : vector<8x128xf32>
    %cst_54 = arith.constant 1.000000e+00 : f32
    %144 = vector.broadcast %cst_54 : f32 to vector<8x128xf32>
    %145 = arith.subf %144, %136 : vector<8x128xf32>
    %146 = arith.mulf %145, %143 : vector<8x128xf32>
    %147 = arith.mulf %136, %113 : vector<8x128xf32>
    %148 = arith.addf %146, %147 : vector<8x128xf32>
    %c24_55 = arith.constant 24 : index
    %c0_56 = arith.constant 0 : index
    %149 = vector.load %arg10[%c24_55, %c0_56] : memref<64x128xf32, #tpu.memory_space<vmem>>, vector<8x128xf32>
    tpu.vector_store %arg10[%c24_55, %c0_56], %148 {strides = array<i32>} : memref<64x128xf32, #tpu.memory_space<vmem>>, vector<8x128xf32>,
    %c32 = arith.constant 32 : index
    %c0_57 = arith.constant 0 : index
    %150 = vector.load %arg9[%c32, %c0_57] : memref<64x384xf32, #tpu.memory_space<vmem>>, vector<8x384xf32>
    %cst_58 = arith.constant dense<0.000000e+00> : vector<8x384xf32>
    %151 = tpu.matmul %148, %7, %cst_58 {dimension_numbers = #tpu.dot_dimension_numbers<[1], [0], [0], [1], [0, 0, 1, 1], [], []>} : vector<8x128xf32>, vector<128x384xf32>, vector<8x384xf32> -> vector<8x384xf32>
    %152 = vector.extract_strided_slice %150 {offsets = [0, 0], sizes = [8, 128], strides = [1, 1]} : vector<8x384xf32> to vector<8x128xf32>
    %153 = vector.extract_strided_slice %151 {offsets = [0, 0], sizes = [8, 128], strides = [1, 1]} : vector<8x384xf32> to vector<8x128xf32>
    %154 = arith.addf %152, %153 : vector<8x128xf32>
    %cst_59 = arith.constant 5.000000e-01 : f32
    %155 = vector.broadcast %cst_59 : f32 to vector<8x128xf32>
    %156 = arith.mulf %155, %154 : vector<8x128xf32>
    %157 = math.tanh %156 : vector<8x128xf32>
    %cst_60 = arith.constant 5.000000e-01 : f32
    %158 = vector.broadcast %cst_60 : f32 to vector<8x128xf32>
    %159 = arith.mulf %158, %157 : vector<8x128xf32>
    %cst_61 = arith.constant 5.000000e-01 : f32
    %160 = vector.broadcast %cst_61 : f32 to vector<8x128xf32>
    %161 = arith.addf %159, %160 : vector<8x128xf32>
    %162 = vector.extract_strided_slice %150 {offsets = [0, 128], sizes = [8, 128], strides = [1, 1]} : vector<8x384xf32> to vector<8x128xf32>
    %163 = vector.extract_strided_slice %151 {offsets = [0, 128], sizes = [8, 128], strides = [1, 1]} : vector<8x384xf32> to vector<8x128xf32>
    %164 = arith.addf %162, %163 : vector<8x128xf32>
    %cst_62 = arith.constant 5.000000e-01 : f32
    %165 = vector.broadcast %cst_62 : f32 to vector<8x128xf32>
    %166 = arith.mulf %165, %164 : vector<8x128xf32>
    %167 = math.tanh %166 : vector<8x128xf32>
    %cst_63 = arith.constant 5.000000e-01 : f32
    %168 = vector.broadcast %cst_63 : f32 to vector<8x128xf32>
    %169 = arith.mulf %168, %167 : vector<8x128xf32>
    %cst_64 = arith.constant 5.000000e-01 : f32
    %170 = vector.broadcast %cst_64 : f32 to vector<8x128xf32>
    %171 = arith.addf %169, %170 : vector<8x128xf32>
    %172 = vector.extract_strided_slice %150 {offsets = [0, 256], sizes = [8, 128], strides = [1, 1]} : vector<8x384xf32> to vector<8x128xf32>
    %173 = vector.extract_strided_slice %151 {offsets = [0, 256], sizes = [8, 128], strides = [1, 1]} : vector<8x384xf32> to vector<8x128xf32>
    %174 = vector.broadcast %8 : vector<1x128xf32> to vector<8x128xf32>
    %175 = arith.addf %173, %174 : vector<8x128xf32>
    %176 = arith.mulf %161, %175 : vector<8x128xf32>
    %177 = arith.addf %172, %176 : vector<8x128xf32>
    %178 = math.tanh %177 : vector<8x128xf32>
    %cst_65 = arith.constant 1.000000e+00 : f32
    %179 = vector.broadcast %cst_65 : f32 to vector<8x128xf32>
    %180 = arith.subf %179, %171 : vector<8x128xf32>
    %181 = arith.mulf %180, %178 : vector<8x128xf32>
    %182 = arith.mulf %171, %148 : vector<8x128xf32>
    %183 = arith.addf %181, %182 : vector<8x128xf32>
    %c32_66 = arith.constant 32 : index
    %c0_67 = arith.constant 0 : index
    %184 = vector.load %arg10[%c32_66, %c0_67] : memref<64x128xf32, #tpu.memory_space<vmem>>, vector<8x128xf32>
    tpu.vector_store %arg10[%c32_66, %c0_67], %183 {strides = array<i32>} : memref<64x128xf32, #tpu.memory_space<vmem>>, vector<8x128xf32>,
    %c40 = arith.constant 40 : index
    %c0_68 = arith.constant 0 : index
    %185 = vector.load %arg9[%c40, %c0_68] : memref<64x384xf32, #tpu.memory_space<vmem>>, vector<8x384xf32>
    %cst_69 = arith.constant dense<0.000000e+00> : vector<8x384xf32>
    %186 = tpu.matmul %183, %7, %cst_69 {dimension_numbers = #tpu.dot_dimension_numbers<[1], [0], [0], [1], [0, 0, 1, 1], [], []>} : vector<8x128xf32>, vector<128x384xf32>, vector<8x384xf32> -> vector<8x384xf32>
    %187 = vector.extract_strided_slice %185 {offsets = [0, 0], sizes = [8, 128], strides = [1, 1]} : vector<8x384xf32> to vector<8x128xf32>
    %188 = vector.extract_strided_slice %186 {offsets = [0, 0], sizes = [8, 128], strides = [1, 1]} : vector<8x384xf32> to vector<8x128xf32>
    %189 = arith.addf %187, %188 : vector<8x128xf32>
    %cst_70 = arith.constant 5.000000e-01 : f32
    %190 = vector.broadcast %cst_70 : f32 to vector<8x128xf32>
    %191 = arith.mulf %190, %189 : vector<8x128xf32>
    %192 = math.tanh %191 : vector<8x128xf32>
    %cst_71 = arith.constant 5.000000e-01 : f32
    %193 = vector.broadcast %cst_71 : f32 to vector<8x128xf32>
    %194 = arith.mulf %193, %192 : vector<8x128xf32>
    %cst_72 = arith.constant 5.000000e-01 : f32
    %195 = vector.broadcast %cst_72 : f32 to vector<8x128xf32>
    %196 = arith.addf %194, %195 : vector<8x128xf32>
    %197 = vector.extract_strided_slice %185 {offsets = [0, 128], sizes = [8, 128], strides = [1, 1]} : vector<8x384xf32> to vector<8x128xf32>
    %198 = vector.extract_strided_slice %186 {offsets = [0, 128], sizes = [8, 128], strides = [1, 1]} : vector<8x384xf32> to vector<8x128xf32>
    %199 = arith.addf %197, %198 : vector<8x128xf32>
    %cst_73 = arith.constant 5.000000e-01 : f32
    %200 = vector.broadcast %cst_73 : f32 to vector<8x128xf32>
    %201 = arith.mulf %200, %199 : vector<8x128xf32>
    %202 = math.tanh %201 : vector<8x128xf32>
    %cst_74 = arith.constant 5.000000e-01 : f32
    %203 = vector.broadcast %cst_74 : f32 to vector<8x128xf32>
    %204 = arith.mulf %203, %202 : vector<8x128xf32>
    %cst_75 = arith.constant 5.000000e-01 : f32
    %205 = vector.broadcast %cst_75 : f32 to vector<8x128xf32>
    %206 = arith.addf %204, %205 : vector<8x128xf32>
    %207 = vector.extract_strided_slice %185 {offsets = [0, 256], sizes = [8, 128], strides = [1, 1]} : vector<8x384xf32> to vector<8x128xf32>
    %208 = vector.extract_strided_slice %186 {offsets = [0, 256], sizes = [8, 128], strides = [1, 1]} : vector<8x384xf32> to vector<8x128xf32>
    %209 = vector.broadcast %8 : vector<1x128xf32> to vector<8x128xf32>
    %210 = arith.addf %208, %209 : vector<8x128xf32>
    %211 = arith.mulf %196, %210 : vector<8x128xf32>
    %212 = arith.addf %207, %211 : vector<8x128xf32>
    %213 = math.tanh %212 : vector<8x128xf32>
    %cst_76 = arith.constant 1.000000e+00 : f32
    %214 = vector.broadcast %cst_76 : f32 to vector<8x128xf32>
    %215 = arith.subf %214, %206 : vector<8x128xf32>
    %216 = arith.mulf %215, %213 : vector<8x128xf32>
    %217 = arith.mulf %206, %183 : vector<8x128xf32>
    %218 = arith.addf %216, %217 : vector<8x128xf32>
    %c40_77 = arith.constant 40 : index
    %c0_78 = arith.constant 0 : index
    %219 = vector.load %arg10[%c40_77, %c0_78] : memref<64x128xf32, #tpu.memory_space<vmem>>, vector<8x128xf32>
    tpu.vector_store %arg10[%c40_77, %c0_78], %218 {strides = array<i32>} : memref<64x128xf32, #tpu.memory_space<vmem>>, vector<8x128xf32>,
    %c48 = arith.constant 48 : index
    %c0_79 = arith.constant 0 : index
    %220 = vector.load %arg9[%c48, %c0_79] : memref<64x384xf32, #tpu.memory_space<vmem>>, vector<8x384xf32>
    %cst_80 = arith.constant dense<0.000000e+00> : vector<8x384xf32>
    %221 = tpu.matmul %218, %7, %cst_80 {dimension_numbers = #tpu.dot_dimension_numbers<[1], [0], [0], [1], [0, 0, 1, 1], [], []>} : vector<8x128xf32>, vector<128x384xf32>, vector<8x384xf32> -> vector<8x384xf32>
    %222 = vector.extract_strided_slice %220 {offsets = [0, 0], sizes = [8, 128], strides = [1, 1]} : vector<8x384xf32> to vector<8x128xf32>
    %223 = vector.extract_strided_slice %221 {offsets = [0, 0], sizes = [8, 128], strides = [1, 1]} : vector<8x384xf32> to vector<8x128xf32>
    %224 = arith.addf %222, %223 : vector<8x128xf32>
    %cst_81 = arith.constant 5.000000e-01 : f32
    %225 = vector.broadcast %cst_81 : f32 to vector<8x128xf32>
    %226 = arith.mulf %225, %224 : vector<8x128xf32>
    %227 = math.tanh %226 : vector<8x128xf32>
    %cst_82 = arith.constant 5.000000e-01 : f32
    %228 = vector.broadcast %cst_82 : f32 to vector<8x128xf32>
    %229 = arith.mulf %228, %227 : vector<8x128xf32>
    %cst_83 = arith.constant 5.000000e-01 : f32
    %230 = vector.broadcast %cst_83 : f32 to vector<8x128xf32>
    %231 = arith.addf %229, %230 : vector<8x128xf32>
    %232 = vector.extract_strided_slice %220 {offsets = [0, 128], sizes = [8, 128], strides = [1, 1]} : vector<8x384xf32> to vector<8x128xf32>
    %233 = vector.extract_strided_slice %221 {offsets = [0, 128], sizes = [8, 128], strides = [1, 1]} : vector<8x384xf32> to vector<8x128xf32>
    %234 = arith.addf %232, %233 : vector<8x128xf32>
    %cst_84 = arith.constant 5.000000e-01 : f32
    %235 = vector.broadcast %cst_84 : f32 to vector<8x128xf32>
    %236 = arith.mulf %235, %234 : vector<8x128xf32>
    %237 = math.tanh %236 : vector<8x128xf32>
    %cst_85 = arith.constant 5.000000e-01 : f32
    %238 = vector.broadcast %cst_85 : f32 to vector<8x128xf32>
    %239 = arith.mulf %238, %237 : vector<8x128xf32>
    %cst_86 = arith.constant 5.000000e-01 : f32
    %240 = vector.broadcast %cst_86 : f32 to vector<8x128xf32>
    %241 = arith.addf %239, %240 : vector<8x128xf32>
    %242 = vector.extract_strided_slice %220 {offsets = [0, 256], sizes = [8, 128], strides = [1, 1]} : vector<8x384xf32> to vector<8x128xf32>
    %243 = vector.extract_strided_slice %221 {offsets = [0, 256], sizes = [8, 128], strides = [1, 1]} : vector<8x384xf32> to vector<8x128xf32>
    %244 = vector.broadcast %8 : vector<1x128xf32> to vector<8x128xf32>
    %245 = arith.addf %243, %244 : vector<8x128xf32>
    %246 = arith.mulf %231, %245 : vector<8x128xf32>
    %247 = arith.addf %242, %246 : vector<8x128xf32>
    %248 = math.tanh %247 : vector<8x128xf32>
    %cst_87 = arith.constant 1.000000e+00 : f32
    %249 = vector.broadcast %cst_87 : f32 to vector<8x128xf32>
    %250 = arith.subf %249, %241 : vector<8x128xf32>
    %251 = arith.mulf %250, %248 : vector<8x128xf32>
    %252 = arith.mulf %241, %218 : vector<8x128xf32>
    %253 = arith.addf %251, %252 : vector<8x128xf32>
    %c48_88 = arith.constant 48 : index
    %c0_89 = arith.constant 0 : index
    %254 = vector.load %arg10[%c48_88, %c0_89] : memref<64x128xf32, #tpu.memory_space<vmem>>, vector<8x128xf32>
    tpu.vector_store %arg10[%c48_88, %c0_89], %253 {strides = array<i32>} : memref<64x128xf32, #tpu.memory_space<vmem>>, vector<8x128xf32>,
    %c56 = arith.constant 56 : index
    %c0_90 = arith.constant 0 : index
    %255 = vector.load %arg9[%c56, %c0_90] : memref<64x384xf32, #tpu.memory_space<vmem>>, vector<8x384xf32>
    %cst_91 = arith.constant dense<0.000000e+00> : vector<8x384xf32>
    %256 = tpu.matmul %253, %7, %cst_91 {dimension_numbers = #tpu.dot_dimension_numbers<[1], [0], [0], [1], [0, 0, 1, 1], [], []>} : vector<8x128xf32>, vector<128x384xf32>, vector<8x384xf32> -> vector<8x384xf32>
    %257 = vector.extract_strided_slice %255 {offsets = [0, 0], sizes = [8, 128], strides = [1, 1]} : vector<8x384xf32> to vector<8x128xf32>
    %258 = vector.extract_strided_slice %256 {offsets = [0, 0], sizes = [8, 128], strides = [1, 1]} : vector<8x384xf32> to vector<8x128xf32>
    %259 = arith.addf %257, %258 : vector<8x128xf32>
    %cst_92 = arith.constant 5.000000e-01 : f32
    %260 = vector.broadcast %cst_92 : f32 to vector<8x128xf32>
    %261 = arith.mulf %260, %259 : vector<8x128xf32>
    %262 = math.tanh %261 : vector<8x128xf32>
    %cst_93 = arith.constant 5.000000e-01 : f32
    %263 = vector.broadcast %cst_93 : f32 to vector<8x128xf32>
    %264 = arith.mulf %263, %262 : vector<8x128xf32>
    %cst_94 = arith.constant 5.000000e-01 : f32
    %265 = vector.broadcast %cst_94 : f32 to vector<8x128xf32>
    %266 = arith.addf %264, %265 : vector<8x128xf32>
    %267 = vector.extract_strided_slice %255 {offsets = [0, 128], sizes = [8, 128], strides = [1, 1]} : vector<8x384xf32> to vector<8x128xf32>
    %268 = vector.extract_strided_slice %256 {offsets = [0, 128], sizes = [8, 128], strides = [1, 1]} : vector<8x384xf32> to vector<8x128xf32>
    %269 = arith.addf %267, %268 : vector<8x128xf32>
    %cst_95 = arith.constant 5.000000e-01 : f32
    %270 = vector.broadcast %cst_95 : f32 to vector<8x128xf32>
    %271 = arith.mulf %270, %269 : vector<8x128xf32>
    %272 = math.tanh %271 : vector<8x128xf32>
    %cst_96 = arith.constant 5.000000e-01 : f32
    %273 = vector.broadcast %cst_96 : f32 to vector<8x128xf32>
    %274 = arith.mulf %273, %272 : vector<8x128xf32>
    %cst_97 = arith.constant 5.000000e-01 : f32
    %275 = vector.broadcast %cst_97 : f32 to vector<8x128xf32>
    %276 = arith.addf %274, %275 : vector<8x128xf32>
    %277 = vector.extract_strided_slice %255 {offsets = [0, 256], sizes = [8, 128], strides = [1, 1]} : vector<8x384xf32> to vector<8x128xf32>
    %278 = vector.extract_strided_slice %256 {offsets = [0, 256], sizes = [8, 128], strides = [1, 1]} : vector<8x384xf32> to vector<8x128xf32>
    %279 = vector.broadcast %8 : vector<1x128xf32> to vector<8x128xf32>
    %280 = arith.addf %278, %279 : vector<8x128xf32>
    %281 = arith.mulf %266, %280 : vector<8x128xf32>
    %282 = arith.addf %277, %281 : vector<8x128xf32>
    %283 = math.tanh %282 : vector<8x128xf32>
    %cst_98 = arith.constant 1.000000e+00 : f32
    %284 = vector.broadcast %cst_98 : f32 to vector<8x128xf32>
    %285 = arith.subf %284, %276 : vector<8x128xf32>
    %286 = arith.mulf %285, %283 : vector<8x128xf32>
    %287 = arith.mulf %276, %253 : vector<8x128xf32>
    %288 = arith.addf %286, %287 : vector<8x128xf32>
    %c56_99 = arith.constant 56 : index
    %c0_100 = arith.constant 0 : index
    %289 = vector.load %arg10[%c56_99, %c0_100] : memref<64x128xf32, #tpu.memory_space<vmem>>, vector<8x128xf32>
    tpu.vector_store %arg10[%c56_99, %c0_100], %288 {strides = array<i32>} : memref<64x128xf32, #tpu.memory_space<vmem>>, vector<8x128xf32>,
    %c0_101 = arith.constant 0 : index
    %c0_102 = arith.constant 0 : index
    %290 = vector.load %arg10[%c0_101, %c0_102] : memref<64x128xf32, #tpu.memory_space<vmem>>, vector<64x128xf32>
    %c0_103 = arith.constant 0 : index
    %c0_104 = arith.constant 0 : index
    %291 = vector.load %arg6[%c0_103, %c0_104] : memref<128x128xf32, #tpu.memory_space<vmem>>, vector<128x128xf32>
    %cst_105 = arith.constant dense<0.000000e+00> : vector<64x128xf32>
    %292 = tpu.matmul %290, %291, %cst_105 {dimension_numbers = #tpu.dot_dimension_numbers<[1], [0], [0], [1], [0, 0, 1, 1], [], []>} : vector<64x128xf32>, vector<128x128xf32>, vector<64x128xf32> -> vector<64x128xf32>
    %c0_106 = arith.constant 0 : index
    %c0_107 = arith.constant 0 : index
    %293 = vector.load %arg7[%c0_106, %c0_107] : memref<1x128xf32, #tpu.memory_space<vmem>>, vector<1x128xf32>
    %294 = vector.broadcast %293 : vector<1x128xf32> to vector<64x128xf32>
    %295 = arith.addf %292, %294 : vector<64x128xf32>
    %cst_108 = arith.constant 0.000000e+00 : f32
    %296 = vector.broadcast %cst_108 : f32 to vector<64x128xf32>
    %297 = arith.maximumf %295, %296 : vector<64x128xf32>
    %298 = vector.extract_strided_slice %297 {offsets = [0, 0], sizes = [8, 128], strides = [1, 1]} : vector<64x128xf32> to vector<8x128xf32>
    %c0_109 = arith.constant 0 : index
    %c0_110 = arith.constant 0 : index
    %299 = vector.load %arg8[%c0_109, %c0_110] : memref<8x1024xf32, #tpu.memory_space<vmem>>, vector<8x128xf32>
    tpu.vector_store %arg8[%c0_109, %c0_110], %298 {strides = array<i32>} : memref<8x1024xf32, #tpu.memory_space<vmem>>, vector<8x128xf32>,
    %300 = vector.extract_strided_slice %297 {offsets = [8, 0], sizes = [8, 128], strides = [1, 1]} : vector<64x128xf32> to vector<8x128xf32>
    %c0_111 = arith.constant 0 : index
    %c128 = arith.constant 128 : index
    %301 = vector.load %arg8[%c0_111, %c128] : memref<8x1024xf32, #tpu.memory_space<vmem>>, vector<8x128xf32>
    tpu.vector_store %arg8[%c0_111, %c128], %300 {strides = array<i32>} : memref<8x1024xf32, #tpu.memory_space<vmem>>, vector<8x128xf32>,
    %302 = vector.extract_strided_slice %297 {offsets = [16, 0], sizes = [8, 128], strides = [1, 1]} : vector<64x128xf32> to vector<8x128xf32>
    %c0_112 = arith.constant 0 : index
    %c256 = arith.constant 256 : index
    %303 = vector.load %arg8[%c0_112, %c256] : memref<8x1024xf32, #tpu.memory_space<vmem>>, vector<8x128xf32>
    tpu.vector_store %arg8[%c0_112, %c256], %302 {strides = array<i32>} : memref<8x1024xf32, #tpu.memory_space<vmem>>, vector<8x128xf32>,
    %304 = vector.extract_strided_slice %297 {offsets = [24, 0], sizes = [8, 128], strides = [1, 1]} : vector<64x128xf32> to vector<8x128xf32>
    %c0_113 = arith.constant 0 : index
    %c384 = arith.constant 384 : index
    %305 = vector.load %arg8[%c0_113, %c384] : memref<8x1024xf32, #tpu.memory_space<vmem>>, vector<8x128xf32>
    tpu.vector_store %arg8[%c0_113, %c384], %304 {strides = array<i32>} : memref<8x1024xf32, #tpu.memory_space<vmem>>, vector<8x128xf32>,
    %306 = vector.extract_strided_slice %297 {offsets = [32, 0], sizes = [8, 128], strides = [1, 1]} : vector<64x128xf32> to vector<8x128xf32>
    %c0_114 = arith.constant 0 : index
    %c512 = arith.constant 512 : index
    %307 = vector.load %arg8[%c0_114, %c512] : memref<8x1024xf32, #tpu.memory_space<vmem>>, vector<8x128xf32>
    tpu.vector_store %arg8[%c0_114, %c512], %306 {strides = array<i32>} : memref<8x1024xf32, #tpu.memory_space<vmem>>, vector<8x128xf32>,
    %308 = vector.extract_strided_slice %297 {offsets = [40, 0], sizes = [8, 128], strides = [1, 1]} : vector<64x128xf32> to vector<8x128xf32>
    %c0_115 = arith.constant 0 : index
    %c640 = arith.constant 640 : index
    %309 = vector.load %arg8[%c0_115, %c640] : memref<8x1024xf32, #tpu.memory_space<vmem>>, vector<8x128xf32>
    tpu.vector_store %arg8[%c0_115, %c640], %308 {strides = array<i32>} : memref<8x1024xf32, #tpu.memory_space<vmem>>, vector<8x128xf32>,
    %310 = vector.extract_strided_slice %297 {offsets = [48, 0], sizes = [8, 128], strides = [1, 1]} : vector<64x128xf32> to vector<8x128xf32>
    %c0_116 = arith.constant 0 : index
    %c768 = arith.constant 768 : index
    %311 = vector.load %arg8[%c0_116, %c768] : memref<8x1024xf32, #tpu.memory_space<vmem>>, vector<8x128xf32>
    tpu.vector_store %arg8[%c0_116, %c768], %310 {strides = array<i32>} : memref<8x1024xf32, #tpu.memory_space<vmem>>, vector<8x128xf32>,
    %312 = vector.extract_strided_slice %297 {offsets = [56, 0], sizes = [8, 128], strides = [1, 1]} : vector<64x128xf32> to vector<8x128xf32>
    %c0_117 = arith.constant 0 : index
    %c896 = arith.constant 896 : index
    %313 = vector.load %arg8[%c0_117, %c896] : memref<8x1024xf32, #tpu.memory_space<vmem>>, vector<8x128xf32>
    tpu.vector_store %arg8[%c0_117, %c896], %312 {strides = array<i32>} : memref<8x1024xf32, #tpu.memory_space<vmem>>, vector<8x128xf32>,
    return
  }
  func.func @transform_0(%arg0: i32) -> (i32, i32) {
    %c0_i32 = arith.constant 0 : i32
    %c0_i32_0 = arith.constant 0 : i32
    %c0_i32_1 = arith.constant 0 : i32
    return %c0_i32, %c0_i32_0 : i32, i32
  }
  func.func @transform_1(%arg0: i32) -> (i32, i32) {
    %c0_i32 = arith.constant 0 : i32
    %c0_i32_0 = arith.constant 0 : i32
    %c0_i32_1 = arith.constant 0 : i32
    return %c0_i32, %c0_i32_0 : i32, i32
  }
  func.func @transform_2(%arg0: i32) -> (i32, i32) {
    %c0_i32 = arith.constant 0 : i32
    %c0_i32_0 = arith.constant 0 : i32
    %c0_i32_1 = arith.constant 0 : i32
    return %c0_i32, %c0_i32_0 : i32, i32
  }
  func.func @transform_3(%arg0: i32) -> (i32, i32) {
    %c0_i32 = arith.constant 0 : i32
    %c0_i32_0 = arith.constant 0 : i32
    %c0_i32_1 = arith.constant 0 : i32
    return %c0_i32, %c0_i32_0 : i32, i32
  }
  func.func @transform_4(%arg0: i32) -> (i32, i32) {
    %c0_i32 = arith.constant 0 : i32
    %c0_i32_0 = arith.constant 0 : i32
    %c0_i32_1 = arith.constant 0 : i32
    return %c0_i32, %c0_i32_0 : i32, i32
  }
  func.func @transform_5(%arg0: i32) -> (i32, i32) {
    %c0_i32 = arith.constant 0 : i32
    %c0_i32_0 = arith.constant 0 : i32
    %c0_i32_1 = arith.constant 0 : i32
    return %c0_i32, %c0_i32_0 : i32, i32
  }
  func.func @transform_6(%arg0: i32) -> (i32, i32) {
    %c0_i32 = arith.constant 0 : i32
    %c0_i32_0 = arith.constant 0 : i32
    %c0_i32_1 = arith.constant 0 : i32
    return %c0_i32, %c0_i32_0 : i32, i32
  }
  func.func @transform_7(%arg0: i32) -> (i32, i32) {
    %c0_i32 = arith.constant 0 : i32
    %c0_i32_0 = arith.constant 0 : i32
    %c0_i32_1 = arith.constant 0 : i32
    return %c0_i32, %c0_i32_0 : i32, i32
  }
}

</mosaic_0001>

<bundles_post_ra>
// kernel: siamese_branch_pallas.1
= control target key start
LH: loop header
LB: loop body
LE: loop exit
PB: predicated region body
PF: predicated region fallthrough
CT: control target
= control target key end

     0   :  { %vm54_vm0 = vcmask 64512   ;;  %v3844_v3 = vmov 0.0   ;;  %vm2461_vm1 = vmmov 0   ;;  %v39_v60 = vlaneseq  ;;  %s3836_s1 = inlined_call_operand.vmem [shape: f32[8,384], index: 1, kind: input, shape index: {}]   ;;  %s3837_s0 = inlined_call_operand.vmem [shape: f32[64,8], index: 0, kind: input, shape index: {}]   ;;  %s3838_s2 = inlined_call_operand.vmem [shape: f32[128,384], index: 2, kind: input, shape index: {}]   ;;  %s3839_s3 = inlined_call_operand.vmem [shape: f32[1,384], index: 3, kind: input, shape index: {}]   ;;  %s3840_s4 = inlined_call_operand.vmem [shape: f32[1,128], index: 4, kind: input, shape index: {}]   ;;  %s3841_s5 = inlined_call_operand.vmem [shape: f32[128,128], index: 5, kind: input, shape index: {}]   ;;  %s3842_s6 = inlined_call_operand.vmem [shape: f32[1,128], index: 6, kind: input, shape index: {}]   ;;  %s3843_s7 = inlined_call_operand.vmem [shape: f32[8,1024], index: 7, kind: output, shape index: {}]  }
   0x1   :  { %v36_v0 = vld [vmem:[%s3836_s1 + $0x10] sm:$0xff]  ;;  %v26_v1 = vld [vmem:[%s3837_s0] sm:$0xff]  ;;  %v2511_v2 = vld [vmem:[%s3837_s0 + $0x8] sm:$0xff]  ;;  %143 = vmatprep.mubr.f32.mxu0 %v3844_v3 }
   0x2   :  { %2023 = vmatprep.subr.mxu1 %v36_v0  ;;  %2025 = vmatprep.mubr.msk.f32.mxu1 %vm54_vm0, %v26_v1  ;;  %v2518_v4 = vld [vmem:[%s3838_s2 + $0x170] sm:$0xff]  ;;  %v2523_v5 = vld [vmem:[%s3838_s2 + $0x168] sm:$0xff]  ;;  %v2528_v6 = vld [vmem:[%s3838_s2 + $0x158] sm:$0xff]  ;;  %v40_v61 = vshrl.u32 %v39_v60, 7 }
   0x3   :  { %3872 = vst [vmem:[#allocation4_spill] sm:$0xff] %v2518_v4  ;;  %2024 = vmatpush3.msra.mxu1 %v36_v0  ;;  %v2536_v7 = vld [vmem:[%s3838_s2 + $0x150] sm:$0xff]  ;;  %v2542_v8 = vld [vmem:[%s3838_s2 + $0x140] sm:$0xff]  ;;  %v2548_v9 = vld [vmem:[%s3838_s2 + $0x138] sm:$0xff] }
   0x4   :  { %2026 = vmatmul.mubr.msk.f32.vlgmr.msra.gmra.mxu1 %vm54_vm0, %v2511_v2  ;;  %373 = vmatprep.subr.mxu1 %v2518_v4  ;;  %v2554_v10 = vld [vmem:[%s3838_s2 + $0x128] sm:$0xff]  ;;  %v2560_v11 = vld [vmem:[%s3838_s2 + $0x120] sm:$0xff]  ;;  %v2565_v12 = vld [vmem:[%s3837_s0 + $0x10] sm:$0xff]  ;;  %v49_v62 = vsub.s32 2, %v40_v61 }
   0x5   :  { %374 = vmatpush1.msra.mxu1 %v2523_v5  ;;  %v2570_v13 = vld [vmem:[%s3837_s0 + $0x18] sm:$0xff]  ;;  %v2576_v14 = vld [vmem:[%s3838_s2 + $0x110] sm:$0xff]  ;;  %2028 = vmatprep.mubr.msk.f32.mxu1 %vm54_vm0, %v2565_v12  ;;  %v2584_v15 = vld [vmem:[%s3838_s2 + $0x108] sm:$0xff] }
   0x6   :  { %375 = vmatprep.subr.mxu1 %v2528_v6  ;;  %v2591_v16 = vld [vmem:[%s3837_s0 + $0x20] sm:$0xff]  ;;  %v2597_v17 = vld [vmem:[%s3838_s2 + $0xf8] sm:$0xff]  ;;  %v2604_v18 = vld [vmem:[%s3837_s0 + $0x28] sm:$0xff] }
   0x7   :  { %376 = vmatpush1.msra.mxu1 %v2536_v7  ;;  %v2610_v19 = vld [vmem:[%s3838_s2 + $0xf0] sm:$0xff]  ;;  %v2621_v21 = vld [vmem:[%s3838_s2 + $0xe0] sm:$0xff]  ;;  %v35_v22 = vld [vmem:[%s3836_s1 + $0x8] sm:$0xff] }
   0x8   :  { %377 = vmatprep.subr.mxu1 %v2542_v8  ;;  %2029 = vmatmul.mubr.msk.f32.gmra.mxu1 %vm54_vm0, %v2570_v13  ;;  %v2615_v20 = vld [vmem:[%s3837_s0 + $0x30] sm:$0xff]  ;;  %v2630_v23 = vld [vmem:[%s3838_s2 + $0xd8] sm:$0xff]  ;;  %v34_v24 = vld [vmem:[%s3836_s1] sm:$0xff] }
   0x9   :  { %378 = vmatpush1.msra.mxu1 %v2548_v9  ;;  %2031 = vmatprep.mubr.msk.f32.mxu1 %vm54_vm0, %v2591_v16  ;;  %v2641_v25 = vld [vmem:[%s3838_s2 + $0xc8] sm:$0xff]  ;;  %v2648_v26 = vld [vmem:[%s3837_s0 + $0x38] sm:$0xff]  ;;  %v2654_v27 = vld [vmem:[%s3838_s2 + $0xc0] sm:$0xff] }
   0xa   :  { %379 = vmatprep.subr.mxu1 %v2554_v10  ;;  %109 = vmatprep.subr.mxu0 %v35_v22  ;;  %v2660_v28 = vld [vmem:[%s3838_s2 + $0xb0] sm:$0xff]  ;;  %v2666_v29 = vld [vmem:[%s3838_s2 + $0xa8] sm:$0xff]  ;;  %v2674_v30 = vld [vmem:[%s3838_s2 + $0x98] sm:$0xff] }
   0xb   :  { %380 = vmatpush1.msra.mxu1 %v2560_v11  ;;  %110 = vmatpush1.msra.mxu0 %v34_v24  ;;  %v2681_v31 = vld [vmem:[%s3838_s2 + $0x90] sm:$0xff]  ;;  %v2688_v32 = vld [vmem:[%s3838_s2 + $0x80] sm:$0xff]  ;;  %v2695_v33 = vld [vmem:[%s3838_s2 + $0x78] sm:$0xff] }
   0xc   :  { %381 = vmatprep.subr.mxu1 %v2576_v14  ;;  %2032 = vmatmul.mubr.msk.f32.gmra.mxu1 %vm54_vm0, %v2604_v18  ;;  %v2702_v34 = vld [vmem:[%s3838_s2 + $0x68] sm:$0xff]  ;;  %v2709_v35 = vld [vmem:[%s3838_s2 + $0x60] sm:$0xff]  ;;  %v2716_v36 = vld [vmem:[%s3838_s2 + $0x50] sm:$0xff] }
   0xd   :  { %382 = vmatpush1.msra.mxu1 %v2584_v15  ;;  %2034 = vmatprep.mubr.msk.f32.mxu1 %vm54_vm0, %v2615_v20  ;;  %v2724_v37 = vld [vmem:[%s3838_s2 + $0x48] sm:$0xff]  ;;  %v2731_v38 = vld [vmem:[%s3838_s2 + $0x38] sm:$0xff]  ;;  %v2738_v39 = vld [vmem:[%s3838_s2 + $0x30] sm:$0xff] }
   0xe   :  { %383 = vmatprep.subr.mxu1 %v2597_v17  ;;  %1836 = vmatmul.mubr.msk.f32.vlgmr.msra.gmra.mxu0 %vm54_vm0, %v26_v1  ;;  %v2745_v40 = vld [vmem:[%s3838_s2 + $0x20] sm:$0xff]  ;;  %v2752_v41 = vld [vmem:[%s3838_s2 + $0x18] sm:$0xff]  ;;  %v2759_v42 = vld [vmem:[%s3838_s2 + $0x8] sm:$0xff] }
   0xf   :  { %384 = vmatpush1.msra.mxu1 %v2610_v19  ;;  %542 = vmatprep.subr.mxu0 %v2518_v4  ;;  %3873 = vst [vmem:[#allocation5_spill] sm:$0xff] %v2745_v40  ;;  %3874 = vst [vmem:[#allocation6_spill] sm:$0xff] %v2752_v41  ;;  %v2767_v43 = vld [vmem:[%s3838_s2] sm:$0xff]  ;;  %v2776_v44 = vld [vmem:[%s3838_s2 + $0x178] sm:$0xff] }
  0x10   :  { %385 = vmatprep.subr.mxu1 %v2621_v21  ;;  %2035 = vmatmul.mubr.msk.f32.gmra.mxu1 %vm54_vm0, %v2648_v26  ;;  %3875 = vst [vmem:[#allocation7_spill] sm:$0xff] %v2759_v42  ;;  %3876 = vst [vmem:[#allocation8_spill] sm:$0xff] %v2767_v43  ;;  %v2786_v45 = vld [vmem:[%s3838_s2 + $0x160] sm:$0xff]  ;;  %v2795_v46 = vld [vmem:[%s3838_s2 + $0x148] sm:$0xff] }
  0x11   :  { %386 = vmatpush1.msra.mxu1 %v2630_v23  ;;  %437 = vmatprep.mubr.f32.mxu1 %v3844_v3  ;;  %v2805_v47 = vld [vmem:[%s3838_s2 + $0x130] sm:$0xff]  ;;  %v2814_v48 = vld [vmem:[%s3838_s2 + $0x118] sm:$0xff]  ;;  %v2823_v49 = vld [vmem:[%s3838_s2 + $0x100] sm:$0xff] }
  0x12   :  { %387 = vmatprep.subr.mxu1 %v2641_v25  ;;  %543 = vmatpush1.msra.mxu0 %v2523_v5  ;;  %v2833_v50 = vld [vmem:[%s3838_s2 + $0xe8] sm:$0xff]  ;;  %v2842_v51 = vld [vmem:[%s3838_s2 + $0xd0] sm:$0xff]  ;;  %v2851_v52 = vld [vmem:[%s3838_s2 + $0xb8] sm:$0xff] }
  0x13   :  { %388 = vmatpush1.msra.mxu1 %v2654_v27  ;;  %149 = vmatprep.mubr.f32.mxu0 %v3844_v3  ;;  %v2861_v53 = vld [vmem:[%s3838_s2 + $0xa0] sm:$0xff]  ;;  %v2870_v54 = vld [vmem:[%s3838_s2 + $0x88] sm:$0xff]  ;;  %v2879_v55 = vld [vmem:[%s3838_s2 + $0x70] sm:$0xff] }
  0x14   :  { %389 = vmatprep.subr.mxu1 %v2660_v28  ;;  %544 = vmatprep.subr.mxu0 %v2528_v6  ;;  %v2889_v56 = vld [vmem:[%s3838_s2 + $0x58] sm:$0xff]  ;;  %v2898_v57 = vld [vmem:[%s3838_s2 + $0x40] sm:$0xff]  ;;  %v2907_v58 = vld [vmem:[%s3838_s2 + $0x28] sm:$0xff] }
  0x15   :  { %390 = vmatpush1.msra.mxu1 %v2666_v29  ;;  %1837 = vmatmul.mubr.msk.f32.gmra.mxu0 %vm54_vm0, %v2511_v2  ;;  %3877 = vst [vmem:[#allocation9_spill] sm:$0xff] %v2907_v58  ;;  %v2917_v59 = vld [vmem:[%s3838_s2 + $0x10] sm:$0xff]  ;;  %v37_v63 = vld [vmem:[%s3839_s3] sm:$0x7] }
  0x16   :  { %391 = vmatprep.subr.mxu1 %v2674_v30  ;;  %545 = vmatpush1.msra.mxu0 %v2536_v7  ;;  %3878 = vst [vmem:[#allocation10_spill] sm:$0xff] %v2917_v59  ;;  %v2968_v0 = vrot.slane %v37_v63, %v49_v62 }
  0x17   :  { %392 = vmatpush1.msra.mxu1 %v2681_v31  ;;  %546 = vmatprep.subr.mxu0 %v2542_v8 }
  0x18   :  { %393 = vmatprep.subr.mxu1 %v2688_v32  ;;  %547 = vmatpush1.msra.mxu0 %v2548_v9 }
  0x19   :  { %394 = vmatpush1.msra.mxu1 %v2695_v33  ;;  %155 = vmatprep.mubr.f32.mxu0 %v3844_v3 }
  0x1a   :  { %395 = vmatprep.subr.mxu1 %v2702_v34  ;;  %548 = vmatprep.subr.mxu0 %v2554_v10 }
  0x1b   :  { %396 = vmatpush1.msra.mxu1 %v2709_v35  ;;  %1838 = vmatmul.mubr.msk.f32.gmra.mxu0 %vm54_vm0, %v2565_v12 }
  0x1c   :  { %397 = vmatprep.subr.mxu1 %v2716_v36  ;;  %549 = vmatpush1.msra.mxu0 %v2560_v11 }
  0x1d   :  { %398 = vmatpush1.msra.mxu1 %v2724_v37  ;;  %550 = vmatprep.subr.mxu0 %v2576_v14 }
  0x1e   :  { %399 = vmatprep.subr.mxu1 %v2731_v38  ;;  %551 = vmatpush1.msra.mxu0 %v2584_v15 }
  0x1f   :  { %400 = vmatpush1.msra.mxu1 %v2738_v39  ;;  %161 = vmatprep.mubr.f32.mxu0 %v3844_v3 }
  0x20   :  { %401 = vmatprep.subr.mxu1 %v2745_v40  ;;  %552 = vmatprep.subr.mxu0 %v2597_v17 }
  0x21   :  { %402 = vmatpush1.msra.mxu1 %v2752_v41  ;;  %1839 = vmatmul.mubr.msk.f32.gmra.mxu0 %vm54_vm0, %v2570_v13 }
  0x22   :  { %403 = vmatprep.subr.mxu1 %v2759_v42  ;;  %553 = vmatpush1.msra.mxu0 %v2610_v19 }
  0x23   :  { %404 = vmatpush1.msra.mxu1 %v2767_v43  ;;  %554 = vmatprep.subr.mxu0 %v2621_v21 }
  0x24   :  { %438 = vmatmul.mubr.f32.vlgmr.msra.gmra.mxu1 %v3844_v3  ;;  %2037 = vmatprep.subr.mxu1 %v3844_v3 }
  0x25   :  { %2038 = vmatpush3.msra.mxu1 %v2776_v44  ;;  %2069 = vmatprep.mubr.msk.f32.mxu1 %vm2461_vm1, %v3844_v3 }
  0x26   :  { %2039 = vmatprep.subr.mxu1 %v3844_v3  ;;  %555 = vmatpush1.msra.mxu0 %v2630_v23 }
  0x27   :  { %2040 = vmatpush3.msra.mxu1 %v2786_v45  ;;  %167 = vmatprep.mubr.f32.mxu0 %v3844_v3 }
  0x28   :  { %2041 = vmatprep.subr.mxu1 %v3844_v3  ;;  %556 = vmatprep.subr.mxu0 %v2641_v25 }
  0x29   :  { %2042 = vmatpush3.msra.mxu1 %v2795_v46  ;;  %1840 = vmatmul.mubr.msk.f32.gmra.mxu0 %vm54_vm0, %v2591_v16 }
  0x2a   :  { %2043 = vmatprep.subr.mxu1 %v3844_v3  ;;  %557 = vmatpush1.msra.mxu0 %v2654_v27 }
  0x2b   :  { %2044 = vmatpush3.msra.mxu1 %v2805_v47  ;;  %558 = vmatprep.subr.mxu0 %v2660_v28 }
  0x2c   :  { %2045 = vmatprep.subr.mxu1 %v3844_v3  ;;  %559 = vmatpush1.msra.mxu0 %v2666_v29 }
  0x2d   :  { %2046 = vmatpush3.msra.mxu1 %v2814_v48  ;;  %173 = vmatprep.mubr.f32.mxu0 %v3844_v3 }
  0x2e   :  { %2047 = vmatprep.subr.mxu1 %v3844_v3  ;;  %560 = vmatprep.subr.mxu0 %v2674_v30 }
  0x2f   :  { %2048 = vmatpush3.msra.mxu1 %v2823_v49  ;;  %1841 = vmatmul.mubr.msk.f32.gmra.mxu0 %vm54_vm0, %v2604_v18 }
  0x30   :  { %2049 = vmatprep.subr.mxu1 %v3844_v3  ;;  %561 = vmatpush1.msra.mxu0 %v2681_v31 }
  0x31   :  { %2050 = vmatpush3.msra.mxu1 %v2833_v50  ;;  %562 = vmatprep.subr.mxu0 %v2688_v32 }
  0x32   :  { %2051 = vmatprep.subr.mxu1 %v3844_v3  ;;  %563 = vmatpush1.msra.mxu0 %v2695_v33 }
  0x33   :  { %2052 = vmatpush3.msra.mxu1 %v2842_v51  ;;  %179 = vmatprep.mubr.f32.mxu0 %v3844_v3 }
  0x34   :  { %2053 = vmatprep.subr.mxu1 %v3844_v3  ;;  %564 = vmatprep.subr.mxu0 %v2702_v34 }
  0x35   :  { %2054 = vmatpush3.msra.mxu1 %v2851_v52  ;;  %1842 = vmatmul.mubr.msk.f32.gmra.mxu0 %vm54_vm0, %v2615_v20 }
  0x36   :  { %2055 = vmatprep.subr.mxu1 %v3844_v3  ;;  %565 = vmatpush1.msra.mxu0 %v2709_v35 }
  0x37   :  { %2056 = vmatpush3.msra.mxu1 %v2861_v53  ;;  %566 = vmatprep.subr.mxu0 %v2716_v36 }
  0x38   :  { %2057 = vmatprep.subr.mxu1 %v3844_v3  ;;  %567 = vmatpush1.msra.mxu0 %v2724_v37 }
  0x39   :  { %2058 = vmatpush3.msra.mxu1 %v2870_v54  ;;  %185 = vmatprep.mubr.f32.mxu0 %v3844_v3 }
  0x3a   :  { %2059 = vmatprep.subr.mxu1 %v3844_v3  ;;  %568 = vmatprep.subr.mxu0 %v2731_v38 }
  0x3b   :  { %2060 = vmatpush3.msra.mxu1 %v2879_v55  ;;  %1843 = vmatmul.mubr.msk.f32.gmra.mxu0 %vm54_vm0, %v2648_v26 }
  0x3c   :  { %2061 = vmatprep.subr.mxu1 %v3844_v3  ;;  %569 = vmatpush1.msra.mxu0 %v2738_v39 }
  0x3d   :  { %2062 = vmatpush3.msra.mxu1 %v2889_v56  ;;  %570 = vmatprep.subr.mxu0 %v2745_v40 }
  0x3e   :  { %2063 = vmatprep.subr.mxu1 %v3844_v3  ;;  %571 = vmatpush1.msra.mxu0 %v2752_v41 }
  0x3f   :  { %2064 = vmatpush3.msra.mxu1 %v2898_v57  ;;  %572 = vmatprep.subr.mxu0 %v2759_v42 }
  0x40   :  { %2065 = vmatprep.subr.mxu1 %v3844_v3  ;;  %573 = vmatpush1.msra.mxu0 %v2767_v43 }
  0x41   :  { %2066 = vmatpush3.msra.mxu1 %v2907_v58  ;;  %606 = vmatprep.mubr.f32.mxu0 %v3844_v3 }
  0x42   :  { %2067 = vmatprep.subr.mxu1 %v3844_v3  ;;  %705 = vmatprep.subr.mxu0 %v2518_v4 }
  0x43   :  { %2068 = vmatpush3.msra.mxu1 %v2917_v59 }
  0x44   :  { %2070 = vmatmul.mubr.f32.vlgmr.msra.gmra.mxu1 %v3844_v3  ;;  %2072 = vmatprep.subr.mxu1 %v3844_v3 }
  0x45   :  { %2073 = vmatpush3.msra.mxu1 %v2776_v44  ;;  %2104 = vmatprep.mubr.msk.f32.mxu1 %vm2461_vm1, %v3844_v3 }
  0x46   :  { %2074 = vmatprep.subr.mxu1 %v3844_v3 }
  0x47   :  { %2075 = vmatpush3.msra.mxu1 %v2786_v45 }
  0x48   :  { %2076 = vmatprep.subr.mxu1 %v3844_v3 }
  0x49   :  { %2077 = vmatpush3.msra.mxu1 %v2795_v46 }
  0x4a   :  { %2078 = vmatprep.subr.mxu1 %v3844_v3 }
  0x4b   :  { %2079 = vmatpush3.msra.mxu1 %v2805_v47 }
  0x4c   :  { %2080 = vmatprep.subr.mxu1 %v3844_v3 }
  0x4d   :  { %2081 = vmatpush3.msra.mxu1 %v2814_v48 }
  0x4e   :  { %2082 = vmatprep.subr.mxu1 %v3844_v3 }
  0x4f   :  { %2083 = vmatpush3.msra.mxu1 %v2823_v49 }
  0x50   :  { %2084 = vmatprep.subr.mxu1 %v3844_v3 }
  0x51   :  { %2085 = vmatpush3.msra.mxu1 %v2833_v50 }
  0x52   :  { %2086 = vmatprep.subr.mxu1 %v3844_v3 }
  0x53   :  { %2087 = vmatpush3.msra.mxu1 %v2842_v51 }
  0x54   :  { %2088 = vmatprep.subr.mxu1 %v3844_v3 }
  0x55   :  { %2089 = vmatpush3.msra.mxu1 %v2851_v52 }
  0x56   :  { %2090 = vmatprep.subr.mxu1 %v3844_v3 }
  0x57   :  { %2091 = vmatpush3.msra.mxu1 %v2861_v53 }
  0x58   :  { %2092 = vmatprep.subr.mxu1 %v3844_v3 }
  0x59   :  { %2093 = vmatpush3.msra.mxu1 %v2870_v54 }
  0x5a   :  { %2094 = vmatprep.subr.mxu1 %v3844_v3 }
  0x5b   :  { %2095 = vmatpush3.msra.mxu1 %v2879_v55 }
  0x5c   :  { %2096 = vmatprep.subr.mxu1 %v3844_v3 }
  0x5d   :  { %2097 = vmatpush3.msra.mxu1 %v2889_v56 }
  0x5e   :  { %2098 = vmatprep.subr.mxu1 %v3844_v3 }
  0x5f   :  { %2099 = vmatpush3.msra.mxu1 %v2898_v57 }
  0x60   :  { %2100 = vmatprep.subr.mxu1 %v3844_v3 }
  0x61   :  { %2101 = vmatpush3.msra.mxu1 %v2907_v58 }
  0x62   :  { %2102 = vmatprep.subr.mxu1 %v3844_v3 }
  0x63   :  { %2103 = vmatpush3.msra.mxu1 %v2917_v59 }
  0x64   :  { %2107 = vmatprep.subr.mxu1 %v3844_v3 }
  0xc4   :  { %v2027_v1 = vpop.f32.mrf.mxu1 }
  0xc5   :  { %v2971_v2 = vadd.f32 %v2027_v1, %v2968_v0 }
  0xc6   :  { %v258_v12 = vpop.f32.mrf.mxu1 }
  0xc7   :  { %3879 = vst [vmem:[#allocation11_spill] sm:$0xff] %v2971_v2 }
  0xc8   :  { %v2030_v13 = vpop.f32.mrf.mxu1 }
  0xc9   :  { %v2974_v16 = vadd.f32 %v2030_v13, %v2968_v0 }
  0xca   :  { %v268_v18 = vpop.f32.mrf.mxu1 }
  0xcb   :  { %3880 = vst [vmem:[#allocation12_spill] sm:$0xff] %v2974_v16  ;;  %v2977_v20 = vadd.f32 %v268_v18, %v2968_v0 }
  0xcc   :  { %v2033_v22 = vpop.f32.mrf.mxu1 }
  0xcd   :  { %3881 = vst [vmem:[#allocation13_spill] sm:$0xff] %v2977_v20  ;;  %v2980_v24 = vadd.f32 %v2033_v22, %v2968_v0  ;;  %v41_v20 = vsub.s32 0, %v40_v61  ;;  %v45_v22 = vsub.s32 1, %v40_v61 }
  0xce   :  { %v278_v26 = vpop.f32.mrf.mxu1  ;;  %v145_v3 = vpop.f32.mrf.mxu0 }
  0xcf   :  { %3882 = vst [vmem:[#allocation14_spill] sm:$0xff] %v2980_v24  ;;  %v2983_v60 = vadd.f32 %v278_v26, %v2968_v0  ;;  %v2995_v24 = vrot.slane %v37_v63, %v41_v20 }
  0xd0   :  { %v2036_v62 = vpop.f32.mrf.mxu1  ;;  %v147_v16 = vpop.f32.mrf.mxu0 }
  0xd1   :  { %3883 = vst [vmem:[#allocation15_spill] sm:$0xff] %v2983_v60  ;;  %v2986_v1 = vadd.f32 %v2036_v62, %v2968_v0  ;;  %3888 = vst [vmem:[#allocation20_spill] sm:$0xff] %v2995_v24  ;;  %v2997_v60 = vrot.slane %v37_v63, %v45_v22 }
  0xd2   :  { %v288_v2 = vpop.f32.mrf.mxu1 }
  0xd3   :  { %3884 = vst [vmem:[#allocation16_spill] sm:$0xff] %v2986_v1  ;;  %v2989_v13 = vadd.f32 %v288_v2, %v2968_v0  ;;  %3889 = vst [vmem:[#allocation21_spill] sm:$0xff] %v2997_v60  ;;  %v146_v2 = vadd.f32 %v145_v3, %v2995_v24  ;;  %v148_v3 = vadd.f32 %v147_v16, %v2997_v60 }
  0xd5   :  { %3885 = vst [vmem:[#allocation17_spill] sm:$0xff] %v2989_v13  ;;  %v2991_v18 = vpop.f32.mrf.mxu0 }
  0xd6   :  { %3886 = vst [vmem:[#allocation18_spill] sm:$0xff] %v2991_v18 }
  0xd7   :  { %v2993_v4 = vpop.f32.mrf.mxu0 }
  0xd8   :  { %3887 = vst [vmem:[#allocation19_spill] sm:$0xff] %v2993_v4 }
  0xdb   :  { %v157_v26 = vpop.f32.mrf.mxu0 }
  0xdc   :  { %v3000_v62 = vadd.f32 %v157_v26, %v2995_v24 }
  0xdd   :  { %v159_v1 = vpop.f32.mrf.mxu0 }
  0xde   :  { %3890 = vst [vmem:[#allocation22_spill] sm:$0xff] %v3000_v62  ;;  %v3003_v59 = vadd.f32 %v159_v1, %v2997_v60 }
  0xe0   :  { %3891 = vst [vmem:[#allocation23_spill] sm:$0xff] %v3003_v59 }
  0xe1   :  { %v163_v18 = vpop.f32.mrf.mxu0 }
  0xe2   :  { %v3007_v43 = vadd.f32 %v163_v18, %v2995_v24 }
  0xe3   :  { %v165_v20 = vpop.f32.mrf.mxu0 }
  0xe4   :  { %v439_v13 = vpop.f32.mrf.mxu1  ;;  %3892 = vst [vmem:[#allocation24_spill] sm:$0xff] %v3007_v43  ;;  %v3010_v4 = vadd.f32 %v165_v20, %v2997_v60 }
  0xe5   :  { %v514_v61 = vadd.f32 %v439_v13, %v146_v2 }
  0xe6   :  { %3893 = vst [vmem:[#allocation25_spill] sm:$0xff] %v3010_v4  ;;  %v441_v18 = vpop.f32.mrf.mxu1 }
  0xe7   :  { %v515_v63 = vmul.f32 0.5, %v514_v61  ;;  %v519_v61 = vadd.f32 %v441_v18, %v148_v3  ;;  %v3037_v3 = vld [vmem:[%s3840_s4] ss:$0 sm:$0xff] }
  0xe9   :  { %v169_v22 = vpop.f32.mrf.mxu0  ;;  %2363 = vtanh.f32 %v515_v63 }
  0xea   :  { %v3013_v26 = vadd.f32 %v169_v22, %v2995_v24 }
  0xeb   :  { %v171_v62 = vpop.f32.mrf.mxu0 }
  0xec   :  { %3894 = vst [vmem:[#allocation26_spill] sm:$0xff] %v3013_v26  ;;  %v3016_v1 = vadd.f32 %v171_v62, %v2997_v60  ;;  %v520_v26 = vmul.f32 0.5, %v519_v61 }
  0xee   :  { %3895 = vst [vmem:[#allocation27_spill] sm:$0xff] %v3016_v1  ;;  %2365 = vtanh.f32 %v520_v26 }
  0xef   :  { %v175_v59 = vpop.f32.mrf.mxu0 }
  0xf0   :  { %v3020_v13 = vadd.f32 %v175_v59, %v2995_v24 }
  0xf1   :  { %v177_v2 = vpop.f32.mrf.mxu0 }
  0xf2   :  { %3896 = vst [vmem:[#allocation28_spill] sm:$0xff] %v3020_v13  ;;  %v3023_v20 = vadd.f32 %v177_v2, %v2997_v60 }
  0xf4   :  { %3897 = vst [vmem:[#allocation29_spill] sm:$0xff] %v3023_v20 }
  0xf5   :  { %v181_v4 = vpop.f32.mrf.mxu0 }
  0xf6   :  { %v3026_v22 = vadd.f32 %v181_v4, %v2995_v24  ;;  %v2364_v16 = vpop.eup %2363 }
  0xf7   :  { %v183_v62 = vpop.f32.mrf.mxu0  ;;  %v517_v13 = vmul.f32 0.5, %v2364_v16 }
  0xf8   :  { %3898 = vst [vmem:[#allocation30_spill] sm:$0xff] %v3026_v22  ;;  %v3029_v63 = vadd.f32 %v183_v62, %v2997_v60  ;;  %v259_v62 = vadd.f32 %v258_v12, %v2968_v0  ;;  %v3902_v0 = vmov 0.0   ;;  %v3904_v12 = vld [vmem:[#allocation10_spill] sm:$0xff] }
  0xf9   :  { %v518_v4 = vadd.f32 0.5, %v517_v13 }
  0xfa   :  { %3899 = vst [vmem:[#allocation31_spill] sm:$0xff] %v3029_v63 }
  0xfb   :  { %v187_v1 = vpop.f32.mrf.mxu0  ;;  %v2366_v26 = vpop.eup %2365 }
  0xfc   :  { %v3032_v59 = vadd.f32 %v187_v1, %v2995_v24  ;;  %v522_v20 = vmul.f32 0.5, %v2366_v26  ;;  %v3909_v26 = vld [vmem:[#allocation21_spill] sm:$0xff] }
  0xfd   :  { %v3112_v13 = vpop.f32.mrf.mxu0 }
  0xfe   :  { %3900 = vst [vmem:[#allocation32_spill] sm:$0xff] %v3032_v59  ;;  %v523_v1 = vadd.f32 0.5, %v522_v20  ;;  %3906 = vst [vmem:[#allocation34_spill] sm:$0xff] %v3112_v13  ;;  %v3907_v20 = vld [vmem:[#allocation20_spill] sm:$0xff] }
 0x100   :  { %v534_v59 = vsub.f32 1.0, %v523_v1  ;;  %v536_v43 = vmul.f32 0.0, %v523_v1  ;;  %v3910_v1 = vld [vmem:[#allocation19_spill] sm:$0xff] }
 0x104   :  { %v510_v18 = vpop.f32.mrf.mxu1 }
 0x105   :  { %v530_v2 = vadd.f32 %v3037_v3, %v510_v18 }
 0x106   :  { %v2071_v61 = vpop.f32.mrf.mxu1 }
 0x107   :  { %v531_v63 = vmul.f32 %v530_v2, %v518_v4 }
 0x109   :  { %v532_v22 = vadd.f32 %v531_v63, %v259_v62 }
 0x10b   :  { %2367 = vtanh.f32 %v532_v22  ;;  %v3908_v22 = vld [vmem:[#allocation18_spill] sm:$0xff] }
 0x10c   :  { %v152_v63 = vadd.f32 %v3908_v22, %v3907_v20  ;;  %v3911_v20 = vld [vmem:[#allocation11_spill] sm:$0xff] }
 0x118   :  { %v2368_v16 = vpop.eup %2367 }
 0x119   :  { %v535_v60 = vmul.f32 %v2368_v16, %v534_v59  ;;  %v154_v16 = vadd.f32 %v3910_v1, %v3909_v26 }
 0x11b   :  { %v3041_v24 = vadd.f32 %v536_v43, %v535_v60  ;;  %v3903_v43 = vld [vmem:[#allocation8_spill] sm:$0xff] }
 0x11c   :  { %v3905_v60 = vld [vmem:[#allocation4_spill] sm:$0xff] }
 0x11d   :  { %3901 = vst [vmem:[#allocation33_spill] sm:$0xff] %v3041_v24  ;;  %607 = vmatmul.mubr.f32.vlgmr.msra.gmra.mxu0 %v3041_v24  ;;  %2105 = vmatmul.mubr.f32.vlgmr.msra.gmra.mxu1 %v3041_v24 }
 0x11e   :  { %706 = vmatpush1.msra.mxu0 %v2523_v5  ;;  %2108 = vmatpush3.msra.mxu1 %v2776_v44 }
 0x11f   :  { %707 = vmatprep.subr.mxu0 %v2528_v6  ;;  %2109 = vmatprep.subr.mxu1 %v3902_v0 }
 0x120   :  { %708 = vmatpush1.msra.mxu0 %v2536_v7  ;;  %2110 = vmatpush3.msra.mxu1 %v2786_v45 }
 0x121   :  { %709 = vmatprep.subr.mxu0 %v2542_v8  ;;  %2111 = vmatprep.subr.mxu1 %v3902_v0 }
 0x122   :  { %710 = vmatpush1.msra.mxu0 %v2548_v9  ;;  %2112 = vmatpush3.msra.mxu1 %v2795_v46 }
 0x123   :  { %711 = vmatprep.subr.mxu0 %v2554_v10  ;;  %2113 = vmatprep.subr.mxu1 %v3902_v0 }
 0x124   :  { %712 = vmatpush1.msra.mxu0 %v2560_v11  ;;  %2114 = vmatpush3.msra.mxu1 %v2805_v47 }
 0x125   :  { %713 = vmatprep.subr.mxu0 %v2576_v14  ;;  %2115 = vmatprep.subr.mxu1 %v3902_v0 }
 0x126   :  { %714 = vmatpush1.msra.mxu0 %v2584_v15  ;;  %2116 = vmatpush3.msra.mxu1 %v2814_v48 }
 0x127   :  { %715 = vmatprep.subr.mxu0 %v2597_v17  ;;  %2117 = vmatprep.subr.mxu1 %v3902_v0 }
 0x128   :  { %716 = vmatpush1.msra.mxu0 %v2610_v19  ;;  %2118 = vmatpush3.msra.mxu1 %v2823_v49 }
 0x129   :  { %717 = vmatprep.subr.mxu0 %v2621_v21  ;;  %2119 = vmatprep.subr.mxu1 %v3902_v0 }
 0x12a   :  { %718 = vmatpush1.msra.mxu0 %v2630_v23  ;;  %2120 = vmatpush3.msra.mxu1 %v2833_v50 }
 0x12b   :  { %719 = vmatprep.subr.mxu0 %v2641_v25  ;;  %2121 = vmatprep.subr.mxu1 %v3902_v0 }
 0x12c   :  { %720 = vmatpush1.msra.mxu0 %v2654_v27  ;;  %2122 = vmatpush3.msra.mxu1 %v2842_v51 }
 0x12d   :  { %721 = vmatprep.subr.mxu0 %v2660_v28  ;;  %2123 = vmatprep.subr.mxu1 %v3902_v0 }
 0x12e   :  { %722 = vmatpush1.msra.mxu0 %v2666_v29  ;;  %2124 = vmatpush3.msra.mxu1 %v2851_v52 }
 0x12f   :  { %723 = vmatprep.subr.mxu0 %v2674_v30  ;;  %2125 = vmatprep.subr.mxu1 %v3902_v0 }
 0x130   :  { %724 = vmatpush1.msra.mxu0 %v2681_v31  ;;  %2126 = vmatpush3.msra.mxu1 %v2861_v53 }
 0x131   :  { %725 = vmatprep.subr.mxu0 %v2688_v32  ;;  %2127 = vmatprep.subr.mxu1 %v3902_v0 }
 0x132   :  { %726 = vmatpush1.msra.mxu0 %v2695_v33  ;;  %2128 = vmatpush3.msra.mxu1 %v2870_v54 }
 0x133   :  { %727 = vmatprep.subr.mxu0 %v2702_v34  ;;  %2129 = vmatprep.subr.mxu1 %v3902_v0 }
 0x134   :  { %728 = vmatpush1.msra.mxu0 %v2709_v35  ;;  %2130 = vmatpush3.msra.mxu1 %v2879_v55 }
 0x135   :  { %729 = vmatprep.subr.mxu0 %v2716_v36  ;;  %2131 = vmatprep.subr.mxu1 %v3902_v0 }
 0x136   :  { %730 = vmatpush1.msra.mxu0 %v2724_v37  ;;  %2132 = vmatpush3.msra.mxu1 %v2889_v56 }
 0x137   :  { %731 = vmatprep.subr.mxu0 %v2731_v38  ;;  %2133 = vmatprep.subr.mxu1 %v3902_v0 }
 0x138   :  { %732 = vmatpush1.msra.mxu0 %v2738_v39  ;;  %2134 = vmatpush3.msra.mxu1 %v2898_v57 }
 0x139   :  { %733 = vmatprep.subr.mxu0 %v2745_v40  ;;  %2135 = vmatprep.subr.mxu1 %v3902_v0 }
 0x13a   :  { %734 = vmatpush1.msra.mxu0 %v2752_v41  ;;  %2136 = vmatpush3.msra.mxu1 %v2907_v58 }
 0x13b   :  { %735 = vmatprep.subr.mxu0 %v2759_v42  ;;  %2137 = vmatprep.subr.mxu1 %v3902_v0 }
 0x13c   :  { %736 = vmatpush1.msra.mxu0 %v3903_v43  ;;  %769 = vmatprep.mubr.f32.mxu0 %v3902_v0 }
 0x13d   :  { %2138 = vmatpush3.msra.mxu1 %v3904_v12  ;;  %2139 = vmatprep.mubr.msk.f32.mxu1 %vm2461_vm1, %v3902_v0 }
 0x13e   :  { %868 = vmatprep.subr.mxu0 %v3905_v60  ;;  %2142 = vmatprep.subr.mxu1 %v3902_v0 }
 0x1dd   :  { %v608_v59 = vpop.f32.mrf.mxu0  ;;  %v679_v18 = vpop.f32.mrf.mxu1 }
 0x1de   :  { %v683_v4 = vadd.f32 %v608_v59, %v152_v63  ;;  %v693_v13 = vadd.f32 %v3037_v3, %v679_v18 }
 0x1df   :  { %v2106_v2 = vpop.f32.mrf.mxu1  ;;  %v610_v62 = vpop.f32.mrf.mxu0 }
 0x1e0   :  { %v684_v61 = vmul.f32 0.5, %v683_v4  ;;  %v688_v12 = vadd.f32 %v610_v62, %v154_v16  ;;  %v3920_v16 = vld [vmem:[#allocation22_spill] sm:$0xff] }
 0x1e2   :  { %2369 = vtanh.f32 %v684_v61  ;;  %v689_v43 = vmul.f32 0.5, %v688_v12  ;;  %v3918_v12 = vld [vmem:[#allocation10_spill] sm:$0xff] }
 0x1e4   :  { %2371 = vtanh.f32 %v689_v43  ;;  %v3917_v43 = vld [vmem:[#allocation8_spill] sm:$0xff] }
 0x1ef   :  { %v2370_v60 = vpop.eup %2369 }
 0x1f0   :  { %v686_v42 = vmul.f32 0.5, %v2370_v60  ;;  %v3919_v60 = vld [vmem:[#allocation4_spill] sm:$0xff] }
 0x1f1   :  { %v2372_v63 = vpop.eup %2371 }
 0x1f2   :  { %v687_v58 = vadd.f32 0.5, %v686_v42  ;;  %v691_v59 = vmul.f32 0.5, %v2372_v63  ;;  %v3915_v42 = vld [vmem:[#allocation9_spill] sm:$0xff] }
 0x1f4   :  { %v694_v41 = vmul.f32 %v693_v13, %v687_v58  ;;  %v692_v4 = vadd.f32 0.5, %v691_v59  ;;  %v3916_v58 = vld [vmem:[#allocation7_spill] sm:$0xff] }
 0x1f6   :  { %v695_v22 = vadd.f32 %v694_v41, %v3911_v20  ;;  %v697_v2 = vsub.f32 1.0, %v692_v4  ;;  %v699_v1 = vmul.f32 %v692_v4, %v3041_v24  ;;  %v3914_v41 = vld [vmem:[#allocation6_spill] sm:$0xff]  ;;  %v3921_v4 = vld [vmem:[#allocation23_spill] sm:$0xff] }
 0x1f8   :  { %2373 = vtanh.f32 %v695_v22 }
 0x205   :  { %v2374_v40 = vpop.eup %2373 }
 0x206   :  { %v698_v61 = vmul.f32 %v2374_v40, %v697_v2  ;;  %v3913_v40 = vld [vmem:[#allocation5_spill] sm:$0xff] }
 0x208   :  { %v3121_v62 = vadd.f32 %v699_v1, %v698_v61 }
 0x20a   :  { %3912 = vst [vmem:[#allocation20_spill] sm:$0xff] %v3121_v62  ;;  %770 = vmatmul.mubr.f32.vlgmr.msra.gmra.mxu0 %v3121_v62  ;;  %2140 = vmatmul.mubr.f32.vlgmr.msra.gmra.mxu1 %v3121_v62 }
 0x20b   :  { %869 = vmatpush1.msra.mxu0 %v2523_v5  ;;  %2143 = vmatpush3.msra.mxu1 %v2776_v44 }
 0x20c   :  { %870 = vmatprep.subr.mxu0 %v2528_v6  ;;  %2144 = vmatprep.subr.mxu1 %v3902_v0 }
 0x20d   :  { %871 = vmatpush1.msra.mxu0 %v2536_v7  ;;  %2145 = vmatpush3.msra.mxu1 %v2786_v45 }
 0x20e   :  { %872 = vmatprep.subr.mxu0 %v2542_v8  ;;  %2146 = vmatprep.subr.mxu1 %v3902_v0 }
 0x20f   :  { %873 = vmatpush1.msra.mxu0 %v2548_v9  ;;  %2147 = vmatpush3.msra.mxu1 %v2795_v46 }
 0x210   :  { %874 = vmatprep.subr.mxu0 %v2554_v10  ;;  %2148 = vmatprep.subr.mxu1 %v3902_v0 }
 0x211   :  { %875 = vmatpush1.msra.mxu0 %v2560_v11  ;;  %2149 = vmatpush3.msra.mxu1 %v2805_v47 }
 0x212   :  { %876 = vmatprep.subr.mxu0 %v2576_v14  ;;  %2150 = vmatprep.subr.mxu1 %v3902_v0 }
 0x213   :  { %877 = vmatpush1.msra.mxu0 %v2584_v15  ;;  %2151 = vmatpush3.msra.mxu1 %v2814_v48 }
 0x214   :  { %878 = vmatprep.subr.mxu0 %v2597_v17  ;;  %2152 = vmatprep.subr.mxu1 %v3902_v0 }
 0x215   :  { %879 = vmatpush1.msra.mxu0 %v2610_v19  ;;  %2153 = vmatpush3.msra.mxu1 %v2823_v49 }
 0x216   :  { %880 = vmatprep.subr.mxu0 %v2621_v21  ;;  %2154 = vmatprep.subr.mxu1 %v3902_v0 }
 0x217   :  { %881 = vmatpush1.msra.mxu0 %v2630_v23  ;;  %2155 = vmatpush3.msra.mxu1 %v2833_v50 }
 0x218   :  { %882 = vmatprep.subr.mxu0 %v2641_v25  ;;  %2156 = vmatprep.subr.mxu1 %v3902_v0 }
 0x219   :  { %883 = vmatpush1.msra.mxu0 %v2654_v27  ;;  %2157 = vmatpush3.msra.mxu1 %v2842_v51 }
 0x21a   :  { %884 = vmatprep.subr.mxu0 %v2660_v28  ;;  %2158 = vmatprep.subr.mxu1 %v3902_v0 }
 0x21b   :  { %885 = vmatpush1.msra.mxu0 %v2666_v29  ;;  %2159 = vmatpush3.msra.mxu1 %v2851_v52 }
 0x21c   :  { %886 = vmatprep.subr.mxu0 %v2674_v30  ;;  %2160 = vmatprep.subr.mxu1 %v3902_v0 }
 0x21d   :  { %887 = vmatpush1.msra.mxu0 %v2681_v31  ;;  %2161 = vmatpush3.msra.mxu1 %v2861_v53 }
 0x21e   :  { %888 = vmatprep.subr.mxu0 %v2688_v32  ;;  %2162 = vmatprep.subr.mxu1 %v3902_v0 }
 0x21f   :  { %889 = vmatpush1.msra.mxu0 %v2695_v33  ;;  %2163 = vmatpush3.msra.mxu1 %v2870_v54 }
 0x220   :  { %890 = vmatprep.subr.mxu0 %v2702_v34  ;;  %2164 = vmatprep.subr.mxu1 %v3902_v0 }
 0x221   :  { %891 = vmatpush1.msra.mxu0 %v2709_v35  ;;  %2165 = vmatpush3.msra.mxu1 %v2879_v55 }
 0x222   :  { %892 = vmatprep.subr.mxu0 %v2716_v36  ;;  %2166 = vmatprep.subr.mxu1 %v3902_v0 }
 0x223   :  { %893 = vmatpush1.msra.mxu0 %v2724_v37  ;;  %2167 = vmatpush3.msra.mxu1 %v2889_v56 }
 0x224   :  { %894 = vmatprep.subr.mxu0 %v2731_v38  ;;  %2168 = vmatprep.subr.mxu1 %v3902_v0 }
 0x225   :  { %895 = vmatpush1.msra.mxu0 %v2738_v39  ;;  %2169 = vmatpush3.msra.mxu1 %v2898_v57 }
 0x226   :  { %896 = vmatprep.subr.mxu0 %v3913_v40  ;;  %2170 = vmatprep.subr.mxu1 %v3902_v0 }
 0x227   :  { %897 = vmatpush1.msra.mxu0 %v3914_v41  ;;  %2171 = vmatpush3.msra.mxu1 %v3915_v42 }
 0x228   :  { %898 = vmatprep.subr.mxu0 %v3916_v58  ;;  %2172 = vmatprep.subr.mxu1 %v3902_v0 }
 0x229   :  { %899 = vmatpush1.msra.mxu0 %v3917_v43  ;;  %932 = vmatprep.mubr.f32.mxu0 %v3902_v0  ;;  %v3922_v43 = vld [vmem:[#allocation13_spill] sm:$0xff] }
 0x22a   :  { %2173 = vmatpush3.msra.mxu1 %v3918_v12  ;;  %2174 = vmatprep.mubr.msk.f32.mxu1 %vm2461_vm1, %v3902_v0 }
 0x22b   :  { %1031 = vmatprep.subr.mxu0 %v3919_v60  ;;  %2177 = vmatprep.subr.mxu1 %v3902_v0 }
 0x2ca   :  { %v771_v13 = vpop.f32.mrf.mxu0  ;;  %v842_v18 = vpop.f32.mrf.mxu1 }
 0x2cb   :  { %v846_v20 = vadd.f32 %v771_v13, %v3920_v16  ;;  %v856_v12 = vadd.f32 %v3037_v3, %v842_v18  ;;  %v3327_v18 = vld [vmem:[%s3838_s2 + $0x120] sm:$0xff] }
 0x2cc   :  { %v2141_v22 = vpop.f32.mrf.mxu1  ;;  %v773_v59 = vpop.f32.mrf.mxu0 }
 0x2cd   :  { %v847_v63 = vmul.f32 0.5, %v846_v20  ;;  %v851_v2 = vadd.f32 %v773_v59, %v3921_v4  ;;  %v3341_v4 = vld [vmem:[%s3838_s2 + $0x108] sm:$0xff] }
 0x2cf   :  { %2375 = vtanh.f32 %v847_v63  ;;  %v852_v1 = vmul.f32 0.5, %v851_v2  ;;  %v3355_v2 = vld [vmem:[%s3838_s2 + $0xf0] sm:$0xff] }
 0x2d1   :  { %2377 = vtanh.f32 %v852_v1  ;;  %v3369_v1 = vld [vmem:[%s3838_s2 + $0xd8] sm:$0xff] }
 0x2dc   :  { %v2376_v61 = vpop.eup %2375 }
 0x2dd   :  { %v849_v26 = vmul.f32 0.5, %v2376_v61  ;;  %v3383_v61 = vld [vmem:[%s3838_s2 + $0xc0] sm:$0xff] }
 0x2de   :  { %v2378_v42 = vpop.eup %2377 }
 0x2df   :  { %v850_v24 = vadd.f32 0.5, %v849_v26  ;;  %v854_v41 = vmul.f32 0.5, %v2378_v42  ;;  %v3285_v42 = vld [vmem:[%s3838_s2 + $0x168] sm:$0xff] }
 0x2e1   :  { %v857_v60 = vmul.f32 %v856_v12, %v850_v24  ;;  %v855_v13 = vadd.f32 0.5, %v854_v41  ;;  %v3313_v12 = vld [vmem:[%s3838_s2 + $0x138] sm:$0xff] }
 0x2e3   :  { %v858_v58 = vadd.f32 %v857_v60, %v3922_v43  ;;  %v860_v16 = vsub.f32 1.0, %v855_v13  ;;  %v862_v22 = vmul.f32 %v855_v13, %v3121_v62  ;;  %v3299_v43 = vld [vmem:[%s3838_s2 + $0x150] sm:$0xff]  ;;  %v3397_v60 = vld [vmem:[%s3838_s2 + $0xa8] sm:$0xff] }
 0x2e4   :  { %v3411_v13 = vld [vmem:[%s3838_s2 + $0x90] sm:$0xff] }
 0x2e5   :  { %2379 = vtanh.f32 %v858_v58  ;;  %v3292_v58 = vld [vmem:[%s3838_s2 + $0x158] sm:$0xff] }
 0x2f2   :  { %v2380_v20 = vpop.eup %2379 }
 0x2f3   :  { %v861_v63 = vmul.f32 %v2380_v20, %v860_v16  ;;  %v3425_v16 = vld [vmem:[%s3838_s2 + $0x78] sm:$0xff]  ;;  %v3439_v20 = vld [vmem:[%s3838_s2 + $0x60] sm:$0xff] }
 0x2f5   :  { %v3197_v59 = vadd.f32 %v862_v22, %v861_v63  ;;  %v3453_v22 = vld [vmem:[%s3838_s2 + $0x48] sm:$0xff]  ;;  %v3467_v63 = vld [vmem:[%s3838_s2 + $0x30] sm:$0xff] }
 0x2f7   :  { %3923 = vst [vmem:[#allocation18_spill] sm:$0xff] %v3197_v59  ;;  %933 = vmatmul.mubr.f32.vlgmr.msra.gmra.mxu0 %v3197_v59  ;;  %2175 = vmatmul.mubr.f32.vlgmr.msra.gmra.mxu1 %v3197_v59 }
 0x2f8   :  { %1032 = vmatpush1.msra.mxu0 %v2523_v5  ;;  %2178 = vmatpush3.msra.mxu1 %v2776_v44  ;;  %v3924_v5 = vld [vmem:[#allocation6_spill] sm:$0xff] }
 0x2f9   :  { %1033 = vmatprep.subr.mxu0 %v2528_v6  ;;  %2179 = vmatprep.subr.mxu1 %v3902_v0  ;;  %v3925_v6 = vld [vmem:[#allocation9_spill] sm:$0xff] }
 0x2fa   :  { %1034 = vmatpush1.msra.mxu0 %v2536_v7  ;;  %2180 = vmatpush3.msra.mxu1 %v2786_v45  ;;  %v3926_v7 = vld [vmem:[#allocation7_spill] sm:$0xff] }
 0x2fb   :  { %1035 = vmatprep.subr.mxu0 %v2542_v8  ;;  %2181 = vmatprep.subr.mxu1 %v3902_v0  ;;  %v3927_v8 = vld [vmem:[#allocation8_spill] sm:$0xff] }
 0x2fc   :  { %1036 = vmatpush1.msra.mxu0 %v2548_v9  ;;  %2182 = vmatpush3.msra.mxu1 %v2795_v46  ;;  %v3928_v9 = vld [vmem:[#allocation10_spill] sm:$0xff] }
 0x2fd   :  { %1037 = vmatprep.subr.mxu0 %v2554_v10  ;;  %2183 = vmatprep.subr.mxu1 %v3902_v0  ;;  %v3269_v10 = vld [vmem:[%s3838_s2 + $0x170] sm:$0xff] }
 0x2fe   :  { %1038 = vmatpush1.msra.mxu0 %v2560_v11  ;;  %2184 = vmatpush3.msra.mxu1 %v2805_v47 }
 0x2ff   :  { %1039 = vmatprep.subr.mxu0 %v2576_v14  ;;  %2185 = vmatprep.subr.mxu1 %v3902_v0 }
 0x300   :  { %1040 = vmatpush1.msra.mxu0 %v2584_v15  ;;  %2186 = vmatpush3.msra.mxu1 %v2814_v48  ;;  %v3929_v15 = vld [vmem:[#allocation24_spill] sm:$0xff] }
 0x301   :  { %1041 = vmatprep.subr.mxu0 %v2597_v17  ;;  %2187 = vmatprep.subr.mxu1 %v3902_v0 }
 0x302   :  { %1042 = vmatpush1.msra.mxu0 %v2610_v19  ;;  %2188 = vmatpush3.msra.mxu1 %v2823_v49 }
 0x303   :  { %1043 = vmatprep.subr.mxu0 %v2621_v21  ;;  %2189 = vmatprep.subr.mxu1 %v3902_v0 }
 0x304   :  { %1044 = vmatpush1.msra.mxu0 %v2630_v23  ;;  %2190 = vmatpush3.msra.mxu1 %v2833_v50 }
 0x305   :  { %1045 = vmatprep.subr.mxu0 %v2641_v25  ;;  %2191 = vmatprep.subr.mxu1 %v3902_v0  ;;  %v3930_v25 = vld [vmem:[#allocation25_spill] sm:$0xff] }
 0x306   :  { %1046 = vmatpush1.msra.mxu0 %v2654_v27  ;;  %2192 = vmatpush3.msra.mxu1 %v2842_v51 }
 0x307   :  { %1047 = vmatprep.subr.mxu0 %v2660_v28  ;;  %2193 = vmatprep.subr.mxu1 %v3902_v0 }
 0x308   :  { %1048 = vmatpush1.msra.mxu0 %v2666_v29  ;;  %2194 = vmatpush3.msra.mxu1 %v2851_v52 }
 0x309   :  { %1049 = vmatprep.subr.mxu0 %v2674_v30  ;;  %2195 = vmatprep.subr.mxu1 %v3902_v0 }
 0x30a   :  { %1050 = vmatpush1.msra.mxu0 %v2681_v31  ;;  %2196 = vmatpush3.msra.mxu1 %v2861_v53 }
 0x30b   :  { %1051 = vmatprep.subr.mxu0 %v2688_v32  ;;  %2197 = vmatprep.subr.mxu1 %v3902_v0 }
 0x30c   :  { %1052 = vmatpush1.msra.mxu0 %v2695_v33  ;;  %2198 = vmatpush3.msra.mxu1 %v2870_v54 }
 0x30d   :  { %1053 = vmatprep.subr.mxu0 %v2702_v34  ;;  %2199 = vmatprep.subr.mxu1 %v3902_v0  ;;  %v3931_v34 = vld [vmem:[#allocation12_spill] sm:$0xff] }
 0x30e   :  { %1054 = vmatpush1.msra.mxu0 %v2709_v35  ;;  %2200 = vmatpush3.msra.mxu1 %v2879_v55 }
 0x30f   :  { %1055 = vmatprep.subr.mxu0 %v2716_v36  ;;  %2201 = vmatprep.subr.mxu1 %v3902_v0 }
 0x310   :  { %1056 = vmatpush1.msra.mxu0 %v2724_v37  ;;  %2202 = vmatpush3.msra.mxu1 %v2889_v56 }
 0x311   :  { %1057 = vmatprep.subr.mxu0 %v2731_v38  ;;  %2203 = vmatprep.subr.mxu1 %v3902_v0 }
 0x312   :  { %1058 = vmatpush1.msra.mxu0 %v2738_v39  ;;  %2204 = vmatpush3.msra.mxu1 %v2898_v57 }
 0x313   :  { %1059 = vmatprep.subr.mxu0 %v3913_v40  ;;  %2205 = vmatprep.subr.mxu1 %v3902_v0 }
 0x314   :  { %1060 = vmatpush1.msra.mxu0 %v3924_v5  ;;  %2206 = vmatpush3.msra.mxu1 %v3925_v6  ;;  %v3481_v5 = vld [vmem:[%s3838_s2 + $0x18] sm:$0xff] }
 0x315   :  { %1061 = vmatprep.subr.mxu0 %v3926_v7  ;;  %2207 = vmatprep.subr.mxu1 %v3902_v0  ;;  %3933 = vst [vmem:[#allocation11_spill] sm:$0xff] %v3481_v5  ;;  %v3495_v7 = vld [vmem:[%s3838_s2] sm:$0xff] }
 0x316   :  { %1062 = vmatpush1.msra.mxu0 %v3927_v8  ;;  %1095 = vmatprep.mubr.f32.mxu0 %v3902_v0  ;;  %3935 = vst [vmem:[#allocation4_spill] sm:$0xff] %v3495_v7 }
 0x317   :  { %2208 = vmatpush3.msra.mxu1 %v3928_v9  ;;  %2209 = vmatprep.mubr.msk.f32.mxu1 %vm2461_vm1, %v3902_v0 }
 0x318   :  { %1194 = vmatprep.subr.mxu0 %v3269_v10  ;;  %2212 = vmatprep.subr.mxu1 %v3902_v0 }
 0x3b7   :  { %v934_v11 = vpop.f32.mrf.mxu0  ;;  %v1005_v14 = vpop.f32.mrf.mxu1 }
 0x3b8   :  { %v1009_v17 = vadd.f32 %v934_v11, %v3929_v15  ;;  %v1019_v32 = vadd.f32 %v3037_v3, %v1005_v14  ;;  %v3936_v11 = vld [vmem:[#allocation26_spill] sm:$0xff] }
 0x3b9   :  { %v2176_v19 = vpop.f32.mrf.mxu1  ;;  %v936_v23 = vpop.f32.mrf.mxu0 }
 0x3ba   :  { %v1010_v21 = vmul.f32 0.5, %v1009_v17  ;;  %v1014_v27 = vadd.f32 %v936_v23, %v3930_v25 }
 0x3bc   :  { %2381 = vtanh.f32 %v1010_v21  ;;  %v1015_v28 = vmul.f32 0.5, %v1014_v27  ;;  %v3937_v21 = vld [vmem:[#allocation27_spill] sm:$0xff] }
 0x3be   :  { %2383 = vtanh.f32 %v1015_v28 }
 0x3c9   :  { %v2382_v29 = vpop.eup %2381 }
 0x3ca   :  { %v1012_v30 = vmul.f32 0.5, %v2382_v29 }
 0x3cb   :  { %v2384_v36 = vpop.eup %2383 }
 0x3cc   :  { %v1013_v31 = vadd.f32 0.5, %v1012_v30  ;;  %v1017_v37 = vmul.f32 0.5, %v2384_v36 }
 0x3ce   :  { %v1020_v33 = vmul.f32 %v1019_v32, %v1013_v31  ;;  %v1018_v38 = vadd.f32 0.5, %v1017_v37  ;;  %v3938_v31 = vld [vmem:[#allocation15_spill] sm:$0xff] }
 0x3d0   :  { %v1021_v35 = vadd.f32 %v1020_v33, %v3931_v34  ;;  %v1023_v39 = vsub.f32 1.0, %v1018_v38  ;;  %v1025_v26 = vmul.f32 %v1018_v38, %v3197_v59 }
 0x3d2   :  { %2385 = vtanh.f32 %v1021_v35 }
 0x3df   :  { %v2386_v24 = vpop.eup %2385 }
 0x3e0   :  { %v1024_v40 = vmul.f32 %v2386_v24, %v1023_v39 }
 0x3e2   :  { %v3278_v41 = vadd.f32 %v1025_v26, %v1024_v40  ;;  %v3517_v26 = vld [vmem:[%s3838_s2 + $0x178] sm:$0xff]  ;;  %v3526_v40 = vld [vmem:[%s3838_s2 + $0x160] sm:$0xff] }
 0x3e4   :  { %3932 = vst [vmem:[#allocation19_spill] sm:$0xff] %v3278_v41  ;;  %1096 = vmatmul.mubr.f32.vlgmr.msra.gmra.mxu0 %v3278_v41  ;;  %2210 = vmatmul.mubr.f32.vlgmr.msra.gmra.mxu1 %v3278_v41 }
 0x3e5   :  { %1195 = vmatpush1.msra.mxu0 %v3285_v42  ;;  %2213 = vmatpush3.msra.mxu1 %v2776_v44  ;;  %v3306_v44 = vld [vmem:[%s3838_s2 + $0x140] sm:$0xff] }
 0x3e6   :  { %1196 = vmatprep.subr.mxu0 %v3292_v58  ;;  %2214 = vmatprep.subr.mxu1 %v3902_v0 }
 0x3e7   :  { %1197 = vmatpush1.msra.mxu0 %v3299_v43  ;;  %2215 = vmatpush3.msra.mxu1 %v2786_v45  ;;  %v3320_v45 = vld [vmem:[%s3838_s2 + $0x128] sm:$0xff] }
 0x3e8   :  { %1198 = vmatprep.subr.mxu0 %v3306_v44  ;;  %2216 = vmatprep.subr.mxu1 %v3902_v0 }
 0x3e9   :  { %1199 = vmatpush1.msra.mxu0 %v3313_v12  ;;  %2217 = vmatpush3.msra.mxu1 %v2795_v46  ;;  %v3334_v46 = vld [vmem:[%s3838_s2 + $0x110] sm:$0xff] }
 0x3ea   :  { %1200 = vmatprep.subr.mxu0 %v3320_v45  ;;  %2218 = vmatprep.subr.mxu1 %v3902_v0 }
 0x3eb   :  { %1201 = vmatpush1.msra.mxu0 %v3327_v18  ;;  %2219 = vmatpush3.msra.mxu1 %v2805_v47  ;;  %v3348_v47 = vld [vmem:[%s3838_s2 + $0xf8] sm:$0xff] }
 0x3ec   :  { %1202 = vmatprep.subr.mxu0 %v3334_v46  ;;  %2220 = vmatprep.subr.mxu1 %v3902_v0 }
 0x3ed   :  { %1203 = vmatpush1.msra.mxu0 %v3341_v4  ;;  %2221 = vmatpush3.msra.mxu1 %v2814_v48  ;;  %v3362_v48 = vld [vmem:[%s3838_s2 + $0xe0] sm:$0xff] }
 0x3ee   :  { %1204 = vmatprep.subr.mxu0 %v3348_v47  ;;  %2222 = vmatprep.subr.mxu1 %v3902_v0 }
 0x3ef   :  { %1205 = vmatpush1.msra.mxu0 %v3355_v2  ;;  %2223 = vmatpush3.msra.mxu1 %v2823_v49  ;;  %v3376_v49 = vld [vmem:[%s3838_s2 + $0xc8] sm:$0xff] }
 0x3f0   :  { %1206 = vmatprep.subr.mxu0 %v3362_v48  ;;  %2224 = vmatprep.subr.mxu1 %v3902_v0 }
 0x3f1   :  { %1207 = vmatpush1.msra.mxu0 %v3369_v1  ;;  %2225 = vmatpush3.msra.mxu1 %v2833_v50  ;;  %v3390_v50 = vld [vmem:[%s3838_s2 + $0xb0] sm:$0xff] }
 0x3f2   :  { %1208 = vmatprep.subr.mxu0 %v3376_v49  ;;  %2226 = vmatprep.subr.mxu1 %v3902_v0 }
 0x3f3   :  { %1209 = vmatpush1.msra.mxu0 %v3383_v61  ;;  %2227 = vmatpush3.msra.mxu1 %v2842_v51  ;;  %v3404_v51 = vld [vmem:[%s3838_s2 + $0x98] sm:$0xff] }
 0x3f4   :  { %1210 = vmatprep.subr.mxu0 %v3390_v50  ;;  %2228 = vmatprep.subr.mxu1 %v3902_v0 }
 0x3f5   :  { %1211 = vmatpush1.msra.mxu0 %v3397_v60  ;;  %2229 = vmatpush3.msra.mxu1 %v2851_v52  ;;  %v3418_v52 = vld [vmem:[%s3838_s2 + $0x80] sm:$0xff] }
 0x3f6   :  { %1212 = vmatprep.subr.mxu0 %v3404_v51  ;;  %2230 = vmatprep.subr.mxu1 %v3902_v0 }
 0x3f7   :  { %1213 = vmatpush1.msra.mxu0 %v3411_v13  ;;  %2231 = vmatpush3.msra.mxu1 %v2861_v53  ;;  %v3432_v53 = vld [vmem:[%s3838_s2 + $0x68] sm:$0xff] }
 0x3f8   :  { %1214 = vmatprep.subr.mxu0 %v3418_v52  ;;  %2232 = vmatprep.subr.mxu1 %v3902_v0 }
 0x3f9   :  { %1215 = vmatpush1.msra.mxu0 %v3425_v16  ;;  %2233 = vmatpush3.msra.mxu1 %v2870_v54  ;;  %v3446_v54 = vld [vmem:[%s3838_s2 + $0x50] sm:$0xff] }
 0x3fa   :  { %1216 = vmatprep.subr.mxu0 %v3432_v53  ;;  %2234 = vmatprep.subr.mxu1 %v3902_v0 }
 0x3fb   :  { %1217 = vmatpush1.msra.mxu0 %v3439_v20  ;;  %2235 = vmatpush3.msra.mxu1 %v2879_v55  ;;  %v3460_v55 = vld [vmem:[%s3838_s2 + $0x38] sm:$0xff] }
 0x3fc   :  { %1218 = vmatprep.subr.mxu0 %v3446_v54  ;;  %2236 = vmatprep.subr.mxu1 %v3902_v0 }
 0x3fd   :  { %1219 = vmatpush1.msra.mxu0 %v3453_v22  ;;  %2237 = vmatpush3.msra.mxu1 %v2889_v56  ;;  %v3474_v56 = vld [vmem:[%s3838_s2 + $0x20] sm:$0xff] }
 0x3fe   :  { %1220 = vmatprep.subr.mxu0 %v3460_v55  ;;  %2238 = vmatprep.subr.mxu1 %v3902_v0 }
 0x3ff   :  { %1221 = vmatpush1.msra.mxu0 %v3467_v63  ;;  %2239 = vmatpush3.msra.mxu1 %v2898_v57  ;;  %v3488_v57 = vld [vmem:[%s3838_s2 + $0x8] sm:$0xff] }
 0x400   :  { %1222 = vmatprep.subr.mxu0 %v3474_v56  ;;  %2240 = vmatprep.subr.mxu1 %v3902_v0  ;;  %3934 = vst [vmem:[#allocation5_spill] sm:$0xff] %v3488_v57 }
 0x401   :  { %1223 = vmatpush1.msra.mxu0 %v3481_v5  ;;  %2241 = vmatpush3.msra.mxu1 %v3925_v6 }
 0x402   :  { %1224 = vmatprep.subr.mxu0 %v3488_v57  ;;  %2242 = vmatprep.subr.mxu1 %v3902_v0 }
 0x403   :  { %1225 = vmatpush1.msra.mxu0 %v3495_v7  ;;  %1258 = vmatprep.mubr.f32.mxu0 %v3902_v0 }
 0x404   :  { %2243 = vmatpush3.msra.mxu1 %v3928_v9  ;;  %2244 = vmatprep.mubr.msk.f32.mxu1 %vm2461_vm1, %v3902_v0 }
 0x405   :  { %1357 = vmatprep.subr.mxu0 %v3269_v10  ;;  %2247 = vmatprep.subr.mxu1 %v3902_v0 }
 0x4a4   :  { %v1097_v6 = vpop.f32.mrf.mxu0  ;;  %v1168_v8 = vpop.f32.mrf.mxu1 }
 0x4a5   :  { %v1172_v14 = vadd.f32 %v1097_v6, %v3936_v11  ;;  %v1182_v29 = vadd.f32 %v3037_v3, %v1168_v8  ;;  %v3535_v6 = vld [vmem:[%s3838_s2 + $0x148] sm:$0xff]  ;;  %v3544_v8 = vld [vmem:[%s3838_s2 + $0x130] sm:$0xff]  ;;  %v3553_v11 = vld [vmem:[%s3838_s2 + $0x118] sm:$0xff] }
 0x4a6   :  { %v2211_v15 = vpop.f32.mrf.mxu1  ;;  %v1099_v19 = vpop.f32.mrf.mxu0 }
 0x4a7   :  { %v1173_v17 = vmul.f32 0.5, %v1172_v14  ;;  %v1177_v23 = vadd.f32 %v1099_v19, %v3937_v21  ;;  %v3562_v14 = vld [vmem:[%s3838_s2 + $0x100] sm:$0xff]  ;;  %v3571_v15 = vld [vmem:[%s3838_s2 + $0xe8] sm:$0xff]  ;;  %v3589_v19 = vld [vmem:[%s3838_s2 + $0xb8] sm:$0xff] }
 0x4a8   :  { %v3598_v21 = vld [vmem:[%s3838_s2 + $0xa0] sm:$0xff] }
 0x4a9   :  { %2387 = vtanh.f32 %v1173_v17  ;;  %v1178_v25 = vmul.f32 0.5, %v1177_v23  ;;  %v3580_v17 = vld [vmem:[%s3838_s2 + $0xd0] sm:$0xff]  ;;  %v3607_v23 = vld [vmem:[%s3838_s2 + $0x88] sm:$0xff] }
 0x4ab   :  { %2389 = vtanh.f32 %v1178_v25  ;;  %v3616_v25 = vld [vmem:[%s3838_s2 + $0x70] sm:$0xff] }
 0x4b6   :  { %v2388_v9 = vpop.eup %2387 }
 0x4b7   :  { %v1175_v27 = vmul.f32 0.5, %v2388_v9  ;;  %v3625_v9 = vld [vmem:[%s3838_s2 + $0x58] sm:$0xff] }
 0x4b8   :  { %v2390_v33 = vpop.eup %2389 }
 0x4b9   :  { %v1176_v28 = vadd.f32 0.5, %v1175_v27  ;;  %v1180_v34 = vmul.f32 0.5, %v2390_v33  ;;  %v3634_v27 = vld [vmem:[%s3838_s2 + $0x40] sm:$0xff] }
 0x4bb   :  { %v1183_v30 = vmul.f32 %v1182_v29, %v1176_v28  ;;  %v1181_v35 = vadd.f32 0.5, %v1180_v34  ;;  %v3643_v28 = vld [vmem:[%s3838_s2 + $0x28] sm:$0xff]  ;;  %v3653_v29 = vld [vmem:[%s3838_s2 + $0x10] sm:$0xff] }
 0x4bc   :  { %3939 = vst [vmem:[#allocation22_spill] sm:$0xff] %v3643_v28  ;;  %3940 = vst [vmem:[#allocation23_spill] sm:$0xff] %v3653_v29 }
 0x4bd   :  { %v1184_v32 = vadd.f32 %v1183_v30, %v3938_v31  ;;  %v1186_v36 = vsub.f32 1.0, %v1181_v35  ;;  %v1188_v38 = vmul.f32 %v1181_v35, %v3278_v41 }
 0x4bf   :  { %2391 = vtanh.f32 %v1184_v32  ;;  %v3941_v32 = vld [vmem:[#allocation28_spill] sm:$0xff] }
 0x4cc   :  { %v2392_v37 = vpop.eup %2391 }
 0x4cd   :  { %v1187_v39 = vmul.f32 %v2392_v37, %v1186_v36  ;;  %v3942_v37 = vld [vmem:[#allocation29_spill] sm:$0xff] }
 0x4cf   :  { %v3509_v24 = vadd.f32 %v1188_v38, %v1187_v39 }
 0x4d1   :  { %1259 = vmatmul.mubr.f32.vlgmr.msra.gmra.mxu0 %v3509_v24  ;;  %2245 = vmatmul.mubr.f32.vlgmr.msra.gmra.mxu1 %v3509_v24 }
 0x4d2   :  { %1358 = vmatpush1.msra.mxu0 %v3285_v42  ;;  %2248 = vmatpush3.msra.mxu1 %v3517_v26 }
 0x4d3   :  { %1359 = vmatprep.subr.mxu0 %v3292_v58  ;;  %2249 = vmatprep.subr.mxu1 %v3902_v0 }
 0x4d4   :  { %1360 = vmatpush1.msra.mxu0 %v3299_v43  ;;  %2250 = vmatpush3.msra.mxu1 %v3526_v40 }
 0x4d5   :  { %1361 = vmatprep.subr.mxu0 %v3306_v44  ;;  %2251 = vmatprep.subr.mxu1 %v3902_v0 }
 0x4d6   :  { %1362 = vmatpush1.msra.mxu0 %v3313_v12  ;;  %2252 = vmatpush3.msra.mxu1 %v3535_v6 }
 0x4d7   :  { %1363 = vmatprep.subr.mxu0 %v3320_v45  ;;  %2253 = vmatprep.subr.mxu1 %v3902_v0 }
 0x4d8   :  { %1364 = vmatpush1.msra.mxu0 %v3327_v18  ;;  %2254 = vmatpush3.msra.mxu1 %v3544_v8 }
 0x4d9   :  { %1365 = vmatprep.subr.mxu0 %v3334_v46  ;;  %2255 = vmatprep.subr.mxu1 %v3902_v0 }
 0x4da   :  { %1366 = vmatpush1.msra.mxu0 %v3341_v4  ;;  %2256 = vmatpush3.msra.mxu1 %v3553_v11 }
 0x4db   :  { %1367 = vmatprep.subr.mxu0 %v3348_v47  ;;  %2257 = vmatprep.subr.mxu1 %v3902_v0 }
 0x4dc   :  { %1368 = vmatpush1.msra.mxu0 %v3355_v2  ;;  %2258 = vmatpush3.msra.mxu1 %v3562_v14 }
 0x4dd   :  { %1369 = vmatprep.subr.mxu0 %v3362_v48  ;;  %2259 = vmatprep.subr.mxu1 %v3902_v0 }
 0x4de   :  { %1370 = vmatpush1.msra.mxu0 %v3369_v1  ;;  %2260 = vmatpush3.msra.mxu1 %v3571_v15 }
 0x4df   :  { %1371 = vmatprep.subr.mxu0 %v3376_v49  ;;  %2261 = vmatprep.subr.mxu1 %v3902_v0 }
 0x4e0   :  { %1372 = vmatpush1.msra.mxu0 %v3383_v61  ;;  %2262 = vmatpush3.msra.mxu1 %v3580_v17 }
 0x4e1   :  { %1373 = vmatprep.subr.mxu0 %v3390_v50  ;;  %2263 = vmatprep.subr.mxu1 %v3902_v0 }
 0x4e2   :  { %1374 = vmatpush1.msra.mxu0 %v3397_v60  ;;  %2264 = vmatpush3.msra.mxu1 %v3589_v19 }
 0x4e3   :  { %1375 = vmatprep.subr.mxu0 %v3404_v51  ;;  %2265 = vmatprep.subr.mxu1 %v3902_v0 }
 0x4e4   :  { %1376 = vmatpush1.msra.mxu0 %v3411_v13  ;;  %2266 = vmatpush3.msra.mxu1 %v3598_v21 }
 0x4e5   :  { %1377 = vmatprep.subr.mxu0 %v3418_v52  ;;  %2267 = vmatprep.subr.mxu1 %v3902_v0 }
 0x4e6   :  { %1378 = vmatpush1.msra.mxu0 %v3425_v16  ;;  %2268 = vmatpush3.msra.mxu1 %v3607_v23 }
 0x4e7   :  { %1379 = vmatprep.subr.mxu0 %v3432_v53  ;;  %2269 = vmatprep.subr.mxu1 %v3902_v0 }
 0x4e8   :  { %1380 = vmatpush1.msra.mxu0 %v3439_v20  ;;  %2270 = vmatpush3.msra.mxu1 %v3616_v25 }
 0x4e9   :  { %1381 = vmatprep.subr.mxu0 %v3446_v54  ;;  %2271 = vmatprep.subr.mxu1 %v3902_v0 }
 0x4ea   :  { %1382 = vmatpush1.msra.mxu0 %v3453_v22  ;;  %2272 = vmatpush3.msra.mxu1 %v3625_v9 }
 0x4eb   :  { %1383 = vmatprep.subr.mxu0 %v3460_v55  ;;  %2273 = vmatprep.subr.mxu1 %v3902_v0 }
 0x4ec   :  { %1384 = vmatpush1.msra.mxu0 %v3467_v63  ;;  %2274 = vmatpush3.msra.mxu1 %v3634_v27 }
 0x4ed   :  { %1385 = vmatprep.subr.mxu0 %v3474_v56  ;;  %2275 = vmatprep.subr.mxu1 %v3902_v0 }
 0x4ee   :  { %1386 = vmatpush1.msra.mxu0 %v3481_v5  ;;  %2276 = vmatpush3.msra.mxu1 %v3643_v28 }
 0x4ef   :  { %1387 = vmatprep.subr.mxu0 %v3488_v57  ;;  %2277 = vmatprep.subr.mxu1 %v3902_v0 }
 0x4f0   :  { %1388 = vmatpush1.msra.mxu0 %v3495_v7  ;;  %1421 = vmatprep.mubr.f32.mxu0 %v3902_v0  ;;  %v3943_v7 = vld [vmem:[#allocation14_spill] sm:$0xff] }
 0x4f1   :  { %2278 = vmatpush3.msra.mxu1 %v3653_v29  ;;  %2279 = vmatprep.mubr.msk.f32.mxu1 %vm2461_vm1, %v3902_v0 }
 0x4f2   :  { %1520 = vmatprep.subr.mxu0 %v3269_v10  ;;  %2282 = vmatprep.subr.mxu1 %v3902_v0 }
 0x591   :  { %v1260_v30 = vpop.f32.mrf.mxu0  ;;  %v1331_v31 = vpop.f32.mrf.mxu1 }
 0x592   :  { %v1335_v33 = vadd.f32 %v1260_v30, %v3941_v32  ;;  %v1345_v29 = vadd.f32 %v3037_v3, %v1331_v31  ;;  %v3944_v3 = vld [vmem:[#allocation11_spill] sm:$0xff] }
 0x593   :  { %v2246_v34 = vpop.f32.mrf.mxu1  ;;  %v1262_v36 = vpop.f32.mrf.mxu0 }
 0x594   :  { %v1336_v35 = vmul.f32 0.5, %v1335_v33  ;;  %v1340_v38 = vadd.f32 %v1262_v36, %v3942_v37  ;;  %v3956_v37 = vld [vmem:[#allocation32_spill] sm:$0xff] }
 0x596   :  { %2393 = vtanh.f32 %v1336_v35  ;;  %v1341_v39 = vmul.f32 0.5, %v1340_v38 }
 0x598   :  { %2395 = vtanh.f32 %v1341_v39 }
 0x5a3   :  { %v2394_v41 = vpop.eup %2393 }
 0x5a4   :  { %v1338_v59 = vmul.f32 0.5, %v2394_v41  ;;  %v3947_v41 = vld [vmem:[#allocation4_spill] sm:$0xff] }
 0x5a5   :  { %v2396_v28 = vpop.eup %2395 }
 0x5a6   :  { %v1339_v62 = vadd.f32 0.5, %v1338_v59  ;;  %v1343_v5 = vmul.f32 0.5, %v2396_v28  ;;  %v3946_v59 = vld [vmem:[#allocation5_spill] sm:$0xff]  ;;  %v3955_v28 = vld [vmem:[#allocation19_spill] sm:$0xff] }
 0x5a8   :  { %v1346_v10 = vmul.f32 %v1345_v29, %v1339_v62  ;;  %v1344_v30 = vadd.f32 0.5, %v1343_v5  ;;  %v3945_v62 = vld [vmem:[#allocation22_spill] sm:$0xff]  ;;  %v3952_v5 = vld [vmem:[#allocation33_spill] sm:$0xff] }
 0x5aa   :  { %v1347_v57 = vadd.f32 %v1346_v10, %v3943_v7  ;;  %v1349_v32 = vsub.f32 1.0, %v1344_v30  ;;  %v1351_v34 = vmul.f32 %v1344_v30, %v3509_v24  ;;  %v1700_v7 = vld [vmem:[%s3841_s5 + $0x60] sm:$0xff] }
 0x5ac   :  { %2397 = vtanh.f32 %v1347_v57  ;;  %v1701_v57 = vld [vmem:[%s3841_s5 + $0x68] sm:$0xff] }
 0x5b9   :  { %v2398_v33 = vpop.eup %2397 }
 0x5ba   :  { %v1350_v35 = vmul.f32 %v2398_v33, %v1349_v32  ;;  %v3957_v32 = vld [vmem:[#allocation21_spill] sm:$0xff]  ;;  %v3958_v33 = vld [vmem:[#allocation34_spill] sm:$0xff] }
 0x5bc   :  { %v3665_v36 = vadd.f32 %v1351_v34, %v1350_v35  ;;  %v190_v34 = vadd.f32 %v3958_v33, %v3957_v32 }
 0x5be   :  { %1422 = vmatmul.mubr.f32.vlgmr.msra.gmra.mxu0 %v3665_v36  ;;  %2280 = vmatmul.mubr.f32.vlgmr.msra.gmra.mxu1 %v3665_v36 }
 0x5bf   :  { %1521 = vmatpush1.msra.mxu0 %v3285_v42  ;;  %2283 = vmatpush3.msra.mxu1 %v3517_v26  ;;  %v3948_v42 = vld [vmem:[#allocation23_spill] sm:$0xff] }
 0x5c0   :  { %1522 = vmatprep.subr.mxu0 %v3292_v58  ;;  %2284 = vmatprep.subr.mxu1 %v3902_v0  ;;  %v1703_v58 = vld [vmem:[%s3841_s5 + $0x78] sm:$0xff] }
 0x5c1   :  { %1523 = vmatpush1.msra.mxu0 %v3299_v43  ;;  %2285 = vmatpush3.msra.mxu1 %v3526_v40  ;;  %v1699_v26 = vld [vmem:[%s3841_s5 + $0x58] sm:$0xff]  ;;  %v1698_v40 = vld [vmem:[%s3841_s5 + $0x50] sm:$0xff] }
 0x5c2   :  { %1524 = vmatprep.subr.mxu0 %v3306_v44  ;;  %2286 = vmatprep.subr.mxu1 %v3902_v0 }
 0x5c3   :  { %1525 = vmatpush1.msra.mxu0 %v3313_v12  ;;  %2287 = vmatpush3.msra.mxu1 %v3535_v6  ;;  %v3949_v12 = vld [vmem:[#allocation30_spill] sm:$0xff]  ;;  %v1697_v6 = vld [vmem:[%s3841_s5 + $0x48] sm:$0xff] }
 0x5c4   :  { %1526 = vmatprep.subr.mxu0 %v3320_v45  ;;  %2288 = vmatprep.subr.mxu1 %v3902_v0 }
 0x5c5   :  { %1527 = vmatpush1.msra.mxu0 %v3327_v18  ;;  %2289 = vmatpush3.msra.mxu1 %v3544_v8  ;;  %v1696_v8 = vld [vmem:[%s3841_s5 + $0x40] sm:$0xff] }
 0x5c6   :  { %1528 = vmatprep.subr.mxu0 %v3334_v46  ;;  %2290 = vmatprep.subr.mxu1 %v3902_v0 }
 0x5c7   :  { %1529 = vmatpush1.msra.mxu0 %v3341_v4  ;;  %2291 = vmatpush3.msra.mxu1 %v3553_v11  ;;  %v1695_v11 = vld [vmem:[%s3841_s5 + $0x38] sm:$0xff] }
 0x5c8   :  { %1530 = vmatprep.subr.mxu0 %v3348_v47  ;;  %2292 = vmatprep.subr.mxu1 %v3902_v0  ;;  %v3950_v47 = vld [vmem:[#allocation31_spill] sm:$0xff] }
 0x5c9   :  { %1531 = vmatpush1.msra.mxu0 %v3355_v2  ;;  %2293 = vmatpush3.msra.mxu1 %v3562_v14  ;;  %v1694_v14 = vld [vmem:[%s3841_s5 + $0x30] sm:$0xff] }
 0x5ca   :  { %1532 = vmatprep.subr.mxu0 %v3362_v48  ;;  %2294 = vmatprep.subr.mxu1 %v3902_v0 }
 0x5cb   :  { %1533 = vmatpush1.msra.mxu0 %v3369_v1  ;;  %2295 = vmatpush3.msra.mxu1 %v3571_v15  ;;  %v1693_v15 = vld [vmem:[%s3841_s5 + $0x28] sm:$0xff] }
 0x5cc   :  { %1534 = vmatprep.subr.mxu0 %v3376_v49  ;;  %2296 = vmatprep.subr.mxu1 %v3902_v0 }
 0x5cd   :  { %1535 = vmatpush1.msra.mxu0 %v3383_v61  ;;  %2297 = vmatpush3.msra.mxu1 %v3580_v17  ;;  %v3742_v61 = vld [vmem:[%s3840_s4] ss:$0 sm:$0xff] }
 0x5ce   :  { %1536 = vmatprep.subr.mxu0 %v3390_v50  ;;  %2298 = vmatprep.subr.mxu1 %v3902_v0  ;;  %v1692_v17 = vld [vmem:[%s3841_s5 + $0x20] sm:$0xff] }
 0x5cf   :  { %1537 = vmatpush1.msra.mxu0 %v3397_v60  ;;  %2299 = vmatpush3.msra.mxu1 %v3589_v19  ;;  %v1691_v19 = vld [vmem:[%s3841_s5 + $0x18] sm:$0xff] }
 0x5d0   :  { %1538 = vmatprep.subr.mxu0 %v3404_v51  ;;  %2300 = vmatprep.subr.mxu1 %v3902_v0  ;;  %v3951_v51 = vld [vmem:[#allocation17_spill] sm:$0xff] }
 0x5d1   :  { %1539 = vmatpush1.msra.mxu0 %v3411_v13  ;;  %2301 = vmatpush3.msra.mxu1 %v3598_v21  ;;  %v1690_v21 = vld [vmem:[%s3841_s5 + $0x10] sm:$0xff] }
 0x5d2   :  { %1540 = vmatprep.subr.mxu0 %v3418_v52  ;;  %2302 = vmatprep.subr.mxu1 %v3902_v0 }
 0x5d3   :  { %1541 = vmatpush1.msra.mxu0 %v3425_v16  ;;  %2303 = vmatpush3.msra.mxu1 %v3607_v23  ;;  %v1689_v23 = vld [vmem:[%s3841_s5 + $0x8] sm:$0xff] }
 0x5d4   :  { %1542 = vmatprep.subr.mxu0 %v3432_v53  ;;  %2304 = vmatprep.subr.mxu1 %v3902_v0 }
 0x5d5   :  { %1543 = vmatpush1.msra.mxu0 %v3439_v20  ;;  %2305 = vmatpush3.msra.mxu1 %v3616_v25  ;;  %v1688_v25 = vld [vmem:[%s3841_s5] sm:$0xff] }
 0x5d6   :  { %1544 = vmatprep.subr.mxu0 %v3446_v54  ;;  %2306 = vmatprep.subr.mxu1 %v3902_v0 }
 0x5d7   :  { %1545 = vmatpush1.msra.mxu0 %v3453_v22  ;;  %2307 = vmatpush3.msra.mxu1 %v3625_v9  ;;  %v3953_v9 = vld [vmem:[#allocation20_spill] sm:$0xff] }
 0x5d8   :  { %1546 = vmatprep.subr.mxu0 %v3460_v55  ;;  %2308 = vmatprep.subr.mxu1 %v3902_v0 }
 0x5d9   :  { %1547 = vmatpush1.msra.mxu0 %v3467_v63  ;;  %2309 = vmatpush3.msra.mxu1 %v3634_v27  ;;  %v3954_v27 = vld [vmem:[#allocation18_spill] sm:$0xff] }
 0x5da   :  { %1548 = vmatprep.subr.mxu0 %v3474_v56  ;;  %2310 = vmatprep.subr.mxu1 %v3902_v0  ;;  %v1702_v56 = vld [vmem:[%s3841_s5 + $0x70] sm:$0xff] }
 0x5db   :  { %1549 = vmatpush1.msra.mxu0 %v3944_v3  ;;  %2311 = vmatpush3.msra.mxu1 %v3945_v62 }
 0x5dc   :  { %1550 = vmatprep.subr.mxu0 %v3946_v59  ;;  %2312 = vmatprep.subr.mxu1 %v3902_v0 }
 0x5dd   :  { %1551 = vmatpush1.msra.mxu0 %v3947_v41  ;;  %1584 = vmatprep.mubr.f32.mxu0 %v3902_v0 }
 0x5de   :  { %2313 = vmatpush3.msra.mxu1 %v3948_v42  ;;  %2314 = vmatprep.mubr.msk.f32.mxu1 %vm2461_vm1, %v3902_v0  ;;  %v3959_v42 = vld [vmem:[#allocation16_spill] sm:$0xff] }
 0x5df   :  { %2317 = vmatprep.subr.mxu0 %v1703_v58 }
 0x67e   :  { %v1423_v43 = vpop.f32.mrf.mxu0  ;;  %v1494_v44 = vpop.f32.mrf.mxu1 }
 0x67f   :  { %v1498_v45 = vadd.f32 %v1423_v43, %v3949_v12  ;;  %v1508_v50 = vadd.f32 %v3742_v61, %v1494_v44  ;;  %v1853_v44 = vld [vmem:[%s3842_s6] ss:$0 sm:$0xff] }
 0x680   :  { %v2281_v18 = vpop.f32.mrf.mxu1  ;;  %v1425_v4 = vpop.f32.mrf.mxu0 }
 0x681   :  { %v1499_v46 = vmul.f32 0.5, %v1498_v45  ;;  %v1503_v2 = vadd.f32 %v1425_v4, %v3950_v47 }
 0x683   :  { %2399 = vtanh.f32 %v1499_v46  ;;  %v1504_v48 = vmul.f32 0.5, %v1503_v2 }
 0x685   :  { %2401 = vtanh.f32 %v1504_v48 }
 0x690   :  { %v2400_v1 = vpop.eup %2399 }
 0x691   :  { %v1501_v49 = vmul.f32 0.5, %v2400_v1 }
 0x692   :  { %v2402_v52 = vpop.eup %2401 }
 0x693   :  { %v1502_v0 = vadd.f32 0.5, %v1501_v49  ;;  %v1506_v16 = vmul.f32 0.5, %v2402_v52 }
 0x695   :  { %v1509_v60 = vmul.f32 %v1508_v50, %v1502_v0  ;;  %v1507_v53 = vadd.f32 0.5, %v1506_v16 }
 0x697   :  { %v1510_v13 = vadd.f32 %v1509_v60, %v3951_v51  ;;  %v1512_v20 = vsub.f32 1.0, %v1507_v53  ;;  %v1514_v22 = vmul.f32 %v1507_v53, %v3665_v36 }
 0x699   :  { %2403 = vtanh.f32 %v1510_v13 }
 0x6a6   :  { %v2404_v54 = vpop.eup %2403 }
 0x6a7   :  { %v1513_v55 = vmul.f32 %v2404_v54, %v1512_v20 }
 0x6a9   :  { %v3747_v63 = vadd.f32 %v1514_v22, %v1513_v55 }
 0x6ab   :  { %1585 = vmatmul.mubr.f32.vlgmr.msra.gmra.mxu0 %v3747_v63  ;;  %2315 = vmatmul.mubr.f32.vlgmr.msra.gmra.mxu1 %v3747_v63 }
 0x6ac   :  { %2318 = vmatpush3.msra.mxu0 %v1703_v58  ;;  %2349 = vmatprep.mubr.f32.mxu0 %v3952_v5 }
 0x6ad   :  { %2319 = vmatprep.subr.mxu0 %v1702_v56 }
 0x6ae   :  { %2320 = vmatpush3.msra.mxu0 %v1702_v56 }
 0x6af   :  { %2321 = vmatprep.subr.mxu0 %v1701_v57 }
 0x6b0   :  { %2322 = vmatpush3.msra.mxu0 %v1701_v57 }
 0x6b1   :  { %2323 = vmatprep.subr.mxu0 %v1700_v7 }
 0x6b2   :  { %2324 = vmatpush3.msra.mxu0 %v1700_v7 }
 0x6b3   :  { %2325 = vmatprep.subr.mxu0 %v1699_v26 }
 0x6b4   :  { %2326 = vmatpush3.msra.mxu0 %v1699_v26 }
 0x6b5   :  { %2327 = vmatprep.subr.mxu0 %v1698_v40 }
 0x6b6   :  { %2328 = vmatpush3.msra.mxu0 %v1698_v40 }
 0x6b7   :  { %2329 = vmatprep.subr.mxu0 %v1697_v6 }
 0x6b8   :  { %2330 = vmatpush3.msra.mxu0 %v1697_v6 }
 0x6b9   :  { %2331 = vmatprep.subr.mxu0 %v1696_v8 }
 0x6ba   :  { %2332 = vmatpush3.msra.mxu0 %v1696_v8 }
 0x6bb   :  { %2333 = vmatprep.subr.mxu0 %v1695_v11 }
 0x6bc   :  { %2334 = vmatpush3.msra.mxu0 %v1695_v11 }
 0x6bd   :  { %2335 = vmatprep.subr.mxu0 %v1694_v14 }
 0x6be   :  { %2336 = vmatpush3.msra.mxu0 %v1694_v14 }
 0x6bf   :  { %2337 = vmatprep.subr.mxu0 %v1693_v15 }
 0x6c0   :  { %2338 = vmatpush3.msra.mxu0 %v1693_v15 }
 0x6c1   :  { %2339 = vmatprep.subr.mxu0 %v1692_v17 }
 0x6c2   :  { %2340 = vmatpush3.msra.mxu0 %v1692_v17 }
 0x6c3   :  { %2341 = vmatprep.subr.mxu0 %v1691_v19 }
 0x6c4   :  { %2342 = vmatpush3.msra.mxu0 %v1691_v19 }
 0x6c5   :  { %2343 = vmatprep.subr.mxu0 %v1690_v21 }
 0x6c6   :  { %2344 = vmatpush3.msra.mxu0 %v1690_v21 }
 0x6c7   :  { %2345 = vmatprep.subr.mxu0 %v1689_v23 }
 0x6c8   :  { %2346 = vmatpush3.msra.mxu0 %v1689_v23 }
 0x6c9   :  { %2347 = vmatprep.subr.mxu0 %v1688_v25 }
 0x6ca   :  { %2348 = vmatpush3.msra.mxu0 %v1688_v25 }
 0x6cb   :  { %2350 = vmatmul.mubr.f32.vlgmr.msra.gmra.mxu0 %v3953_v9 }
 0x6cc   :  { %2352 = vmatprep.mubr.f32.mxu0 %v3954_v27 }
 0x6cf   :  { %2353 = vmatmul.mubr.f32.gmra.mxu0 %v3955_v28 }
 0x6d0   :  { %2355 = vmatprep.mubr.f32.mxu0 %v3509_v24 }
 0x6d3   :  { %2356 = vmatmul.mubr.f32.gmra.mxu0 %v3665_v36 }
 0x6d4   :  { %2358 = vmatprep.mubr.f32.mxu0 %v3747_v63 }
 0x76b   :  { %v1586_v29 = vpop.f32.mrf.mxu0  ;;  %v1657_v31 = vpop.f32.mrf.mxu1 }
 0x76c   :  { %v1661_v38 = vadd.f32 %v1586_v29, %v3956_v37  ;;  %v1671_v36 = vadd.f32 %v3742_v61, %v1657_v31 }
 0x76d   :  { %v2316_v39 = vpop.f32.mrf.mxu1  ;;  %v1588_v30 = vpop.f32.mrf.mxu0 }
 0x76e   :  { %v1662_v10 = vmul.f32 0.5, %v1661_v38  ;;  %v1666_v35 = vadd.f32 %v1588_v30, %v190_v34 }
 0x770   :  { %2405 = vtanh.f32 %v1662_v10  ;;  %v1667_v3 = vmul.f32 0.5, %v1666_v35 }
 0x772   :  { %2407 = vtanh.f32 %v1667_v3 }
 0x77d   :  { %v2406_v62 = vpop.eup %2405 }
 0x77e   :  { %v1664_v24 = vmul.f32 0.5, %v2406_v62 }
 0x77f   :  { %v2408_v43 = vpop.eup %2407 }
 0x780   :  { %v1665_v59 = vadd.f32 0.5, %v1664_v24  ;;  %v1669_v12 = vmul.f32 0.5, %v2408_v43 }
 0x782   :  { %v1672_v41 = vmul.f32 %v1671_v36, %v1665_v59  ;;  %v1670_v4 = vadd.f32 0.5, %v1669_v12 }
 0x784   :  { %v1673_v58 = vadd.f32 %v1672_v41, %v3959_v42  ;;  %v1675_v61 = vsub.f32 1.0, %v1670_v4  ;;  %v1677_v20 = vmul.f32 %v1670_v4, %v3747_v63 }
 0x786   :  { %2409 = vtanh.f32 %v1673_v58 }
 0x78b   :  { %v2351_v45 = vpop.f32.mrf.mxu0 }
 0x78c   :  { %v1783_v18 = vadd.f32 %v2351_v45, %v1853_v44 }
 0x78d   :  { %v1777_v46 = vpop.f32.mrf.mxu0 }
 0x78e   :  { %v1817_v47 = vmax.f32 %v1783_v18, 0.0  ;;  %v1778_v2 = vadd.f32 %v1853_v44, %v1777_v46 }
 0x78f   :  { %v2354_v48 = vpop.f32.mrf.mxu0 }
 0x790   :  { %1825 = vst [vmem:[%s3843_s7 + $0x8] sm:$0xff] %v1817_v47  ;;  %v1816_v1 = vmax.f32 %v1778_v2, 0.0  ;;  %v1793_v49 = vadd.f32 %v2354_v48, %v1853_v44 }
 0x791   :  { %v1787_v0 = vpop.f32.mrf.mxu0 }
 0x792   :  { %1824 = vst [vmem:[%s3843_s7] sm:$0xff] %v1816_v1  ;;  %v1819_v50 = vmax.f32 %v1793_v49, 0.0  ;;  %v1788_v60 = vadd.f32 %v1853_v44, %v1787_v0 }
 0x793   :  { %v2410_v51 = vpop.eup %2409  ;;  %v2357_v13 = vpop.f32.mrf.mxu0 }
 0x794   :  { %1827 = vst [vmem:[%s3843_s7 + $0x18] sm:$0xff] %v1819_v50  ;;  %v1818_v52 = vmax.f32 %v1788_v60, 0.0  ;;  %v1803_v16 = vadd.f32 %v2357_v13, %v1853_v44  ;;  %v1676_v53 = vmul.f32 %v2410_v51, %v1675_v61 }
 0x795   :  { %v1797_v54 = vpop.f32.mrf.mxu0 }
 0x796   :  { %1826 = vst [vmem:[%s3843_s7 + $0x10] sm:$0xff] %v1818_v52  ;;  %v1821_v22 = vmax.f32 %v1803_v16, 0.0  ;;  %v1798_v55 = vadd.f32 %v1853_v44, %v1797_v54  ;;  %v1678_v56 = vadd.f32 %v1677_v20, %v1676_v53 }
 0x798   :  { %1829 = vst [vmem:[%s3843_s7 + $0x28] sm:$0xff] %v1821_v22  ;;  %v1820_v5 = vmax.f32 %v1798_v55, 0.0  ;;  %2359 = vmatmul.mubr.f32.gmra.mxu0 %v1678_v56 }
 0x79a   :  { %1828 = vst [vmem:[%s3843_s7 + $0x20] sm:$0xff] %v1820_v5 }
 0x858   :  { %v2360_v57 = vpop.f32.mrf.mxu0 }
 0x859   :  { %v1813_v63 = vadd.f32 %v2360_v57, %v1853_v44 }
 0x85a   :  { %v1807_v7 = vpop.f32.mrf.mxu0 }
 0x85b   :  { %v1823_v26 = vmax.f32 %v1813_v63, 0.0  ;;  %v1808_v40 = vadd.f32 %v1853_v44, %v1807_v7 }
 0x85d   :  { %1831 = vst [vmem:[%s3843_s7 + $0x38] sm:$0xff] %v1823_v26  ;;  %v1822_v6 = vmax.f32 %v1808_v40, 0.0 }
 0x85f   :  { %1830 = vst [vmem:[%s3843_s7 + $0x30] sm:$0xff] %v1822_v6 }

</bundles_post_ra>
